<compile_context>
chip_gen: v7x
topology: tpu7x:2x2x1
jax: 0.10.0
libtpu: 0.0.40
codegen_flags: <defaults>
</compile_context>

<pallas_src>
import functools

import jax
import jax.numpy as jnp
from jax import lax
from jax.experimental import pallas as pl
from jax.experimental.pallas import tpu as pltpu

NRING = 8  # row-gather ring depth (outstanding DMAs per grid step)


def _round_up(x, m):
    return (x + m - 1) // m * m


def _choose_bb(B, S, Dp, stage_budget_bytes=8 << 20):
    """Batch rows per grid step: multiple of 8, <= 64, staging buffer within budget,
    and small enough that batches > 8 give >= 2 grid tiles (v7x megacore)."""
    bb_cap = max(8, min(64, (stage_budget_bytes // (S * Dp * 4)) // 8 * 8))
    Bp8 = _round_up(max(B, 1), 8)
    if Bp8 <= 8:
        return 8
    return max(8, min(bb_cap, _round_up((Bp8 + 1) // 2, 8)))


def _masked_mean_and_head(acc, mv, w_ref, b_ref, h_ref, y_ref):
    """acc: (BB, Dp) mask-weighted embedding sum, mv: (BB, S) mask."""
    denom = jnp.sum(mv, axis=1, keepdims=True)            # (BB, 1)
    inv = pl.reciprocal(denom, approx=True)                # EUP estimate
    inv = inv * (2.0 - denom * inv)                        # one Newton step -> f32 accuracy
    h = acc * inv                                          # (BB, Dp)
    h_ref[...] = h
    y_ref[...] = (jnp.dot(h, w_ref[...], preferred_element_type=jnp.float32)
                  + b_ref[...])


# ----------------------------------------------------------------------------
# Path A: large vocab — table stays in HBM, ring-buffered per-row gather DMAs.
# ----------------------------------------------------------------------------
def _glove_avg_hbm_kernel(ids_ref,     # (Bp*S,) int32  SMEM (scalar prefetch, flat)
                          table_hbm,   # (V, Dp) f32    HBM (pl.ANY)
                          w_ref,       # (Dp, Cp) f32   VMEM (resident)
                          b_ref,       # (1, Cp) f32    VMEM
                          mask_ref,    # (BB, S) f32    VMEM tile
                          h_ref,       # (BB, Dp) f32   out
                          y_ref,       # (BB, Cp) f32   out
                          stage_ref,   # (BB, S, Dp) f32 VMEM scratch (row staging)
                          sem,         # (nring,) DMA semaphores
                          *, nring):
    bb, s, dp = stage_ref.shape
    n_tok = bb * s
    base = pl.program_id(0) * n_tok        # flattened token offset of this batch tile

    def desc(t, row):
        r = t // s
        si = t - r * s
        return pltpu.make_async_copy(
            table_hbm.at[pl.ds(row, 1), :],
            stage_ref.at[r, pl.ds(si, 1), :],
            sem.at[t % nring],
        )

    def fetch(t):
        desc(t, ids_ref[base + t]).start()

    def wait_done(t):
        desc(t, ids_ref[base + t]).wait()

    # Prime the ring: keep `nring` row DMAs in flight at all times.
    for t in range(nring):                  # static unroll (nring is small)
        fetch(t)

    if n_tok > nring:
        def body(t, c):
            row_next = ids_ref[base + t]    # read SMEM id before the DMA wait
            wait_done(t - nring)            # issued nring steps ago -> effectively done
            desc(t, row_next).start()
            return c
        lax.fori_loop(nring, n_tok, body, 0)

    # Drain the last `nring` outstanding fetches.
    for i in range(nring):                  # static unroll
        wait_done(n_tok - nring + i)

    mv = mask_ref[...]                                     # (BB, S)
    acc = jnp.sum(stage_ref[...] * mv[:, :, None], axis=1)  # (BB, Dp)
    _masked_mean_and_head(acc, mv, w_ref, b_ref, h_ref, y_ref)


# ----------------------------------------------------------------------------
# Path B: small vocab — whole (padded) table resident in VMEM, MXU bag-of-words.
# ----------------------------------------------------------------------------
def _glove_avg_vmem_kernel(ids_ref,     # (BB, S) int32  VMEM tile
                           table_ref,   # (V, Dp) f32    VMEM (whole table)
                           w_ref,       # (Dp, Cp) f32
                           b_ref,       # (1, Cp) f32
                           mask_ref,    # (BB, S) f32
                           h_ref,       # (BB, Dp) f32   out
                           y_ref):      # (BB, Cp) f32   out
    ids = ids_ref[...]
    mv = mask_ref[...]
    bb, s = ids.shape
    v = table_ref.shape[0]
    # Mask-weighted bag-of-words: bow[b, w] = sum_s mv[b,s] * [ids[b,s] == w]
    vocab_iota = lax.broadcasted_iota(jnp.int32, (bb, s, v), 2)
    bow = jnp.sum(jnp.where(vocab_iota == ids[:, :, None], mv[:, :, None], 0.0),
                  axis=1)                                               # (BB, V)
    acc = jnp.dot(bow, table_ref[...], preferred_element_type=jnp.float32)  # (BB, Dp)
    _masked_mean_and_head(acc, mv, w_ref, b_ref, h_ref, y_ref)


def glove_avg_forward(input_ids, attention_mask, table, w, b,
                      *, force_hbm_gather=False,
                      vmem_table_budget=4 << 20,
                      vmem_onehot_budget=8 << 20):
    """input_ids (B,S) int, attention_mask (B,S), table (V,300), w (300,C), b (C,)."""
    B, S = input_ids.shape
    V, D = table.shape
    C = w.shape[1]

    Dp = _round_up(D, 128)      # 300 -> 384 : lane-dense embedding rows / h stores
    Cp = _round_up(C, 128)      # 2   -> 128 : lane-dense head output
    BB = _choose_bb(B, S, Dp)
    Bp = _round_up(B, BB)
    n_tiles = Bp // BB

    ids_p = jnp.pad(input_ids.astype(jnp.int32), ((0, Bp - B), (0, 0)))
    # Padded batch rows use mask=1.0 so denom >= 1; their h/y are sliced off below.
    mask_p = jnp.pad(attention_mask.astype(jnp.float32), ((0, Bp - B), (0, 0)),
                     constant_values=1.0)
    table_p = jnp.pad(table.astype(jnp.float32), ((0, 0), (0, Dp - D)))
    w_p = jnp.pad(w.astype(jnp.float32), ((0, Dp - D), (0, Cp - C)))
    b_p = jnp.pad(b.astype(jnp.float32).reshape(1, C), ((0, 0), (0, Cp - C)))

    out_shape = (jax.ShapeDtypeStruct((Bp, Dp), jnp.float32),
                 jax.ShapeDtypeStruct((Bp, Cp), jnp.float32))
    out_specs = [pl.BlockSpec((BB, Dp), lambda g, *_: (g, 0)),   # h
                 pl.BlockSpec((BB, Cp), lambda g, *_: (g, 0))]   # y

    use_vmem_table = ((not force_hbm_gather)
                      and V * Dp * 4 <= vmem_table_budget
                      and BB * S * V * 4 <= vmem_onehot_budget)

    if use_vmem_table:
        kernel = _glove_avg_vmem_kernel
        grid_spec = pltpu.PrefetchScalarGridSpec(
            num_scalar_prefetch=0,
            grid=(n_tiles,),
            in_specs=[
                pl.BlockSpec((BB, S), lambda g: (g, 0)),        # ids tile (VMEM)
                pl.BlockSpec((V, Dp), lambda g: (0, 0)),        # whole table (resident)
                pl.BlockSpec((Dp, Cp), lambda g: (0, 0)),       # head weight
                pl.BlockSpec((1, Cp), lambda g: (0, 0)),        # head bias
                pl.BlockSpec((BB, S), lambda g: (g, 0)),        # mask tile
            ],
            out_specs=out_specs,
            scratch_shapes=[],
        )
        args = (ids_p, table_p, w_p, b_p, mask_p)
    else:
        nring = min(NRING, BB * S)
        kernel = functools.partial(_glove_avg_hbm_kernel, nring=nring)
        grid_spec = pltpu.PrefetchScalarGridSpec(
            num_scalar_prefetch=1,                              # flat ids -> SMEM
            grid=(n_tiles,),
            in_specs=[
                pl.BlockSpec(memory_space=pl.ANY),              # GloVe table stays in HBM
                pl.BlockSpec((Dp, Cp), lambda g, ids: (0, 0)),  # head weight (resident)
                pl.BlockSpec((1, Cp), lambda g, ids: (0, 0)),   # head bias
                pl.BlockSpec((BB, S), lambda g, ids: (g, 0)),   # mask tile
            ],
            out_specs=out_specs,
            scratch_shapes=[
                pltpu.VMEM((BB, S, Dp), jnp.float32),           # gathered-row staging
                pltpu.SemaphoreType.DMA((nring,)),              # gather ring semaphores
            ],
        )
        # NOTE: the last batch tile fetches rows for padded batch rows too (ids=0);
        # results for those rows are discarded by the slice below.
        args = (ids_p.reshape(Bp * S), table_p, w_p, b_p, mask_p)

    h_p, y_p = pl.pallas_call(
        kernel,
        out_shape=out_shape,
        grid_spec=grid_spec,
        compiler_params=pltpu.CompilerParams(
            dimension_semantics=("parallel",),                  # batch tiles across TCs (v7x)
            vmem_limit_bytes=32 * 1024 * 1024,
        ),
    )(*args)

    return h_p[:B, :D], y_p[:B, :C]


def reference_forward(input_ids, attention_mask, table, w, b):
    mask = attention_mask.astype(jnp.float32)[:, :, None]             # (B, S, 1)
    embeds = table[input_ids]                                         # (B, S, D)
    avg = jnp.sum(embeds * mask, axis=1) / jnp.sum(mask, axis=1)      # (B, D)
    y = avg @ w + b[None, :]                                          # (B, C)
    return avg, y


if __name__ == "__main__":
    # Synthetic, deterministic parameters (GloVe dim = 300, num_classes = 2).
    # TODO(synk): real get_glove() table loading has no in-script equivalent; a small
    # synthetic vocab is used instead.
    B, S, V, D, C = 2, 8, 512, 300, 2

    key = jax.random.PRNGKey(0)
    k_tab, k_w, k_b, k_ids, k_len = jax.random.split(key, 5)

    table = jax.random.normal(k_tab, (V, D), dtype=jnp.float32) * 0.1
    w = jax.random.normal(k_w, (D, C), dtype=jnp.float32) * 0.05      # Linear(300, C), pre-transposed
    bias = jax.random.normal(k_b, (C,), dtype=jnp.float32) * 0.05

    input_ids = jax.random.randint(k_ids, (B, S), 0, V, dtype=jnp.int32)
    lengths = jax.random.randint(k_len, (B,), 1, S + 1)               # >= 1 valid token
    attention_mask = (jnp.arange(S)[None, :] < lengths[:, None]).astype(jnp.float32)

    h_ref, y_ref = reference_forward(input_ids, attention_mask, table, w, bias)

    # Small-vocab fast path (table VMEM-resident, MXU bag-of-words gather).
    h1, y1 = glove_avg_forward(input_ids, attention_mask, table, w, bias)
    # Large-vocab path (HBM table + ring-buffered row-gather DMAs) — forced here so the
    # real-GloVe code path is exercised and validated too.
    h2, y2 = glove_avg_forward(input_ids, attention_mask, table, w, bias,
                               force_hbm_gather=True)
    jax.block_until_ready((h1, y1, h2, y2))

    for name, (h, y) in {"vmem": (h1, y1), "hbm": (h2, y2)}.items():
        assert jnp.allclose(h, h_ref, atol=1e-4, rtol=1e-4), f"h mismatch ({name})"
        assert jnp.allclose(y, y_ref, atol=1e-4, rtol=1e-4), f"y mismatch ({name})"

    print("KERNEL_OK")
</pallas_src>

<mosaic_0001>
module attributes {stable_mosaic.version = 11 : i64} {
  func.func @_glove_avg_vmem_kernel(%arg0: i32, %arg1: memref<8x8xi32, #tpu.memory_space<vmem>>, %arg2: memref<512x384xf32, #tpu.memory_space<vmem>>, %arg3: memref<384x128xf32, #tpu.memory_space<vmem>>, %arg4: memref<1x128xf32, #tpu.memory_space<vmem>>, %arg5: memref<8x8xf32, #tpu.memory_space<vmem>>, %arg6: memref<8x384xf32, #tpu.memory_space<vmem>>, %arg7: memref<8x128xf32, #tpu.memory_space<vmem>>) attributes {dimension_semantics = [#tpu.dimension_semantics<parallel>], iteration_bounds = array<i64: 1>, scalar_prefetch = 0 : i64, scratch_operands = 0 : i64, tpu.core_type = #tpu.core_type<tc>, window_params = [{transform_indices = @transform_0, window_bounds = array<i64: 8, 8>}, {pipeline_mode = #tpu.pipeline_mode<synchronous>, transform_indices = @transform_1, window_bounds = array<i64: 512, 384>}, {pipeline_mode = #tpu.pipeline_mode<synchronous>, transform_indices = @transform_2, window_bounds = array<i64: 384, 128>}, {pipeline_mode = #tpu.pipeline_mode<synchronous>, transform_indices = @transform_3, window_bounds = array<i64: 1, 128>}, {transform_indices = @transform_4, window_bounds = array<i64: 8, 8>}, {transform_indices = @transform_5, window_bounds = array<i64: 8, 384>}, {transform_indices = @transform_6, window_bounds = array<i64: 8, 128>}]} {
    %c0 = arith.constant 0 : index
    %c0_0 = arith.constant 0 : index
    %0 = vector.load %arg1[%c0, %c0_0] : memref<8x8xi32, #tpu.memory_space<vmem>>, vector<8x8xi32>
    %c0_1 = arith.constant 0 : index
    %c0_2 = arith.constant 0 : index
    %1 = vector.load %arg5[%c0_1, %c0_2] : memref<8x8xf32, #tpu.memory_space<vmem>>, vector<8x8xf32>
    %2 = tpu.iota {dimensions = array<i32: 2>} : vector<8x8x512xi32>
    %3 = vector.shape_cast %0 : vector<8x8xi32> to vector<8x8x1xi32>
    %4 = vector.broadcast %3 : vector<8x8x1xi32> to vector<8x8x512xi32>
    %5 = arith.cmpi eq, %2, %4 : vector<8x8x512xi32>
    %6 = vector.shape_cast %1 : vector<8x8xf32> to vector<8x8x1xf32>
    %cst = arith.constant 0.000000e+00 : f32
    %7 = vector.shape_cast %6 : vector<8x8x1xf32> to vector<8x8x1xf32>
    %8 = vector.broadcast %7 : vector<8x8x1xf32> to vector<8x8x512xf32>
    %9 = vector.broadcast %cst : f32 to vector<8x8x512xf32>
    %10 = arith.select %5, %8, %9 : vector<8x8x512xi1>, vector<8x8x512xf32>
    %cst_3 = arith.constant dense<0.000000e+00> : vector<8x512xf32>
    %11 = vector.multi_reduction <add>, %10, %cst_3 [1] : vector<8x8x512xf32> to vector<8x512xf32>
    %c0_4 = arith.constant 0 : index
    %c0_5 = arith.constant 0 : index
    %12 = vector.load %arg2[%c0_4, %c0_5] : memref<512x384xf32, #tpu.memory_space<vmem>>, vector<512x384xf32>
    %cst_6 = arith.constant dense<0.000000e+00> : vector<8x384xf32>
    %13 = tpu.matmul %11, %12, %cst_6 {dimension_numbers = #tpu.dot_dimension_numbers<[1], [0], [0], [1], [0, 0, 1, 1], [], []>} : vector<8x512xf32>, vector<512x384xf32>, vector<8x384xf32> -> vector<8x384xf32>
    %cst_7 = arith.constant dense<0.000000e+00> : vector<8xf32>
    %14 = vector.multi_reduction <add>, %1, %cst_7 [1] : vector<8x8xf32> to vector<8xf32>
    %15 = vector.shape_cast %14 : vector<8xf32> to vector<8x1xf32>
    %16 = tpu.reciprocal %15 {approx = true} : vector<8x1xf32> -> vector<8x1xf32>
    %17 = arith.mulf %15, %16 : vector<8x1xf32>
    %cst_8 = arith.constant 2.000000e+00 : f32
    %18 = vector.broadcast %cst_8 : f32 to vector<8x1xf32>
    %19 = arith.subf %18, %17 : vector<8x1xf32>
    %20 = arith.mulf %16, %19 : vector<8x1xf32>
    %21 = vector.broadcast %20 : vector<8x1xf32> to vector<8x384xf32>
    %22 = arith.mulf %13, %21 : vector<8x384xf32>
    %c0_9 = arith.constant 0 : index
    %c0_10 = arith.constant 0 : index
    %23 = vector.load %arg6[%c0_9, %c0_10] : memref<8x384xf32, #tpu.memory_space<vmem>>, vector<8x384xf32>
    tpu.vector_store %arg6[%c0_9, %c0_10], %22 {strides = array<i32>} : memref<8x384xf32, #tpu.memory_space<vmem>>, vector<8x384xf32>,
    %c0_11 = arith.constant 0 : index
    %c0_12 = arith.constant 0 : index
    %24 = vector.load %arg3[%c0_11, %c0_12] : memref<384x128xf32, #tpu.memory_space<vmem>>, vector<384x128xf32>
    %cst_13 = arith.constant dense<0.000000e+00> : vector<8x128xf32>
    %25 = tpu.matmul %22, %24, %cst_13 {dimension_numbers = #tpu.dot_dimension_numbers<[1], [0], [0], [1], [0, 0, 1, 1], [], []>} : vector<8x384xf32>, vector<384x128xf32>, vector<8x128xf32> -> vector<8x128xf32>
    %c0_14 = arith.constant 0 : index
    %c0_15 = arith.constant 0 : index
    %26 = vector.load %arg4[%c0_14, %c0_15] : memref<1x128xf32, #tpu.memory_space<vmem>>, vector<1x128xf32>
    %27 = vector.broadcast %26 : vector<1x128xf32> to vector<8x128xf32>
    %28 = arith.addf %25, %27 : vector<8x128xf32>
    %c0_16 = arith.constant 0 : index
    %c0_17 = arith.constant 0 : index
    %29 = vector.load %arg7[%c0_16, %c0_17] : memref<8x128xf32, #tpu.memory_space<vmem>>, vector<8x128xf32>
    tpu.vector_store %arg7[%c0_16, %c0_17], %28 {strides = array<i32>} : memref<8x128xf32, #tpu.memory_space<vmem>>, vector<8x128xf32>,
    return
  }
  func.func @transform_0(%arg0: i32) -> (i32, i32) {
    %c0_i32 = arith.constant 0 : i32
    %c0_i32_0 = arith.constant 0 : i32
    return %arg0, %c0_i32 : i32, i32
  }
  func.func @transform_1(%arg0: i32) -> (i32, i32) {
    %c0_i32 = arith.constant 0 : i32
    %c0_i32_0 = arith.constant 0 : i32
    %c0_i32_1 = arith.constant 0 : i32
    return %c0_i32, %c0_i32_0 : i32, i32
  }
  func.func @transform_2(%arg0: i32) -> (i32, i32) {
    %c0_i32 = arith.constant 0 : i32
    %c0_i32_0 = arith.constant 0 : i32
    %c0_i32_1 = arith.constant 0 : i32
    return %c0_i32, %c0_i32_0 : i32, i32
  }
  func.func @transform_3(%arg0: i32) -> (i32, i32) {
    %c0_i32 = arith.constant 0 : i32
    %c0_i32_0 = arith.constant 0 : i32
    %c0_i32_1 = arith.constant 0 : i32
    return %c0_i32, %c0_i32_0 : i32, i32
  }
  func.func @transform_4(%arg0: i32) -> (i32, i32) {
    %c0_i32 = arith.constant 0 : i32
    %c0_i32_0 = arith.constant 0 : i32
    return %arg0, %c0_i32 : i32, i32
  }
  func.func @transform_5(%arg0: i32) -> (i32, i32) {
    %c0_i32 = arith.constant 0 : i32
    %c0_i32_0 = arith.constant 0 : i32
    return %arg0, %c0_i32 : i32, i32
  }
  func.func @transform_6(%arg0: i32) -> (i32, i32) {
    %c0_i32 = arith.constant 0 : i32
    %c0_i32_0 = arith.constant 0 : i32
    return %arg0, %c0_i32 : i32, i32
  }
}

</mosaic_0001>

<bundles_post_ra>
// kernel: tpu_custom_call.1
= control target key start
LH: loop header
LB: loop body
LE: loop exit
PB: predicated region body
PF: predicated region fallthrough
CT: control target
= control target key end

     0   :  { %12 = vsyncpa [#allocation3], 0  ;;  %s2207_s0 = inlined_call_operand.hbm [shape: s32[8,8], index: 0, kind: input, shape index: {}]   ;;  %s2208_s1 = inlined_call_operand.hbm [shape: f32[512,384], index: 1, kind: input, shape index: {}]   ;;  %s2209_s2 = inlined_call_operand.hbm [shape: f32[384,128], index: 2, kind: input, shape index: {}]   ;;  %s2210_s3 = inlined_call_operand.vmem [shape: f32[1,128], index: 3, kind: input, shape index: {}]   ;;  %s2211_s4 = inlined_call_operand.vmem [shape: f32[8,8], index: 4, kind: input, shape index: {}]   ;;  %s2212_s5 = inlined_call_operand.hbm [shape: f32[8,384], index: 5, kind: output, shape index: {0}]   ;;  %s2213_s6 = inlined_call_operand.hbm [shape: f32[8,128], index: 6, kind: output, shape index: {1}]  }
   0x1   :  { %13 = vsyncpa [#allocation6], 0 }
   0x2   :  { %14 = vsyncpa [#allocation4], 0 }
   0x3   :  { %15 = vsyncpa [#allocation10], 0  ;;  %s1764_s21 = smov [#allocation5]   ;;  %s1646_s25 = scalar_lea.hbm %s2208_s1, 24576 }
   0x4   :  { %s31_s22 = sshll.u32 %s1764_s21, 4  ;;  %p1647_p0 = scmp.ne.s32.totalorder %s2208_s1, %s1646_s25  ;;  %s32_s22 = int_to_ptr.vmem [resolvable:$true] %s31_s22 }
   0x5   :  { %p1650_p1 = scmp.lt.u32.totalorder %s1646_s25, %s2208_s1 }
   0x7   :  { %p1652_p2 = pnand %p1650_p1, %p1647_p0 }
   0x9   :  { %1655 = shalt.err (!%p1652_p2)
}
   0xa   :  { %s1656_s30 = scalar_lea.vmem %s32_s22, 24576  ;;  %p1661_p4 = scmp.lt.s32.totalorder %s32_s22, %s32_s22 }
   0xb   :  { %p1657_p3 = scmp.ne.s32.totalorder %s32_s22, %s1656_s30  ;;  %p1662_p5 = scmp.lt.s32.totalorder %s1656_s30, %s1656_s30 }
   0xd   :  { %p1663_p6 = por %p1662_p5, %p1661_p4 }
   0xf   :  { %p1664_p7 = pnand %p1663_p6, %p1657_p3 }
  0x11   :  { %1667 = shalt.err (!%p1664_p7)
}
  0x12   :  { %s1765_s7 = smov 384   ;;  %s1766_s8 = smov 24  }
  0x13   :  { %37 = dma.hbm_to_vmem [thread:$0]  %s2208_s1, 24576, %s32_s22, [#allocation6], %s1765_s7, %s1765_s7, %s1766_s8  }
  0x14   :  { %s1767_s11 = smov [#allocation2]   ;;  %s1768_s13 = smov [#allocation7]  }
  0x15   :  { %s22_s12 = sshll.u32 %s1767_s11, 4  ;;  %s43_s14 = sshll.u32 %s1768_s13, 4  ;;  %s23_s12 = int_to_ptr.vmem [resolvable:$true] %s22_s12  ;;  %s44_s14 = int_to_ptr.vmem [resolvable:$true] %s43_s14 }
  0x16   :  { %s1668_s17 = scalar_lea.hbm %s2207_s0, 128 }
  0x17   :  { %p1669_p8 = scmp.ne.s32.totalorder %s2207_s0, %s1668_s17  ;;  %p1672_p9 = scmp.lt.u32.totalorder %s1668_s17, %s2207_s0 }
  0x19   :  { %p1674_p10 = pnand %p1672_p9, %p1669_p8 }
  0x1b   :  { %1677 = shalt.err (!%p1674_p10)
}
  0x1c   :  { %s1678_s1 = scalar_lea.vmem %s23_s12, 128  ;;  %p1683_p12 = scmp.lt.s32.totalorder %s23_s12, %s23_s12 }
  0x1d   :  { %p1679_p11 = scmp.ne.s32.totalorder %s23_s12, %s1678_s1  ;;  %p1684_p13 = scmp.lt.s32.totalorder %s1678_s1, %s1678_s1 }
  0x1f   :  { %p1685_p0 = por %p1684_p13, %p1683_p12 }
  0x21   :  { %p1686_p1 = pnand %p1685_p0, %p1679_p11 }
  0x23   :  { %1689 = shalt.err (!%p1686_p1)
}
  0x24   :  { %25 = dma.hbm_to_vmem [thread:$0]  %s2207_s0, 128, %s23_s12, [#allocation3]  }
  0x25   :  { %s1690_s26 = scalar_lea.hbm %s2209_s2, 6144 }
  0x26   :  { %p1691_p2 = scmp.ne.s32.totalorder %s2209_s2, %s1690_s26  ;;  %p1694_p3 = scmp.lt.u32.totalorder %s1690_s26, %s2209_s2 }
  0x28   :  { %p1696_p4 = pnand %p1694_p3, %p1691_p2 }
  0x2a   :  { %1699 = shalt.err (!%p1696_p4)
}
  0x2b   :  { %s1700_s7 = scalar_lea.vmem %s44_s14, 6144  ;;  %p1705_p6 = scmp.lt.s32.totalorder %s44_s14, %s44_s14 }
  0x2c   :  { %p1701_p5 = scmp.ne.s32.totalorder %s44_s14, %s1700_s7  ;;  %p1706_p7 = scmp.lt.s32.totalorder %s1700_s7, %s1700_s7 }
  0x2e   :  { %p1707_p8 = por %p1706_p7, %p1705_p6 }
  0x30   :  { %p1708_p9 = pnand %p1707_p8, %p1701_p5 }
  0x32   :  { %1711 = shalt.err (!%p1708_p9)
}
  0x33   :  { %s1769_s0 = smov 128   ;;  %s1770_s8 = smov 8  }
  0x34   :  { %49 = dma.hbm_to_vmem [thread:$0]  %s2209_s2, 6144, %s44_s14, [#allocation6], %s1769_s0, %s1769_s0, %s1770_s8  }
  0x35   :  { %1756 = dma.done.wait [#allocation3], 128  }
  0x36   :  { %1757 = vsyncadd [#allocation3], 4294967168 }
  0x37   :  { %1758 = dma.done.wait [#allocation6], 30720  }
  0x38   :  { %1759 = vsyncadd [#allocation6], 4294936576  ;;  %v65_v0 = vlaneseq  ;;  %v1853_v5 = vld [vmem:[#allocation2] sm:$0xff]  ;;  %v439_v9 = vld [vmem:[#allocation5 + $0x8] sm:$0xff] }
  0x39   :  { %v1858_v6 = vld [vmem:[%s2211_s4] sm:$0xff]  ;;  %v442_v10 = vld [vmem:[#allocation5 + $0x20] sm:$0xff]  ;;  %v448_v17 = vld [vmem:[#allocation5 + $0x50] sm:$0xff] }
  0x3a   :  { %v1848_v1 = vshrl.u32 %v65_v0, 7  ;;  %v438_v11 = vld [vmem:[#allocation5] sm:$0xff]  ;;  %v441_v12 = vld [vmem:[#allocation5 + $0x18] sm:$0xff]  ;;  %v1381_v18 = vpack.c.bf16 %v442_v10, %v439_v9  ;;  %v444_v21 = vld [vmem:[#allocation5 + $0x30] sm:$0xff] }
  0x3b   :  { %v445_v16 = vld [vmem:[#allocation5 + $0x38] sm:$0xff]  ;;  %v1383_v19 = vpack.c.bf16 %v441_v12, %v438_v11  ;;  %v447_v22 = vld [vmem:[#allocation5 + $0x48] sm:$0xff]  ;;  %v454_v27 = vld [vmem:[#allocation5 + $0x80] sm:$0xff] }
  0x3c   :  { %v86_v2 = vsub.s32 2, %v1848_v1  ;;  %v72_v3 = vsub.s32 0, %v1848_v1  ;;  %v79_v4 = vsub.s32 1, %v1848_v1  ;;  %v93_v15 = vsub.s32 3, %v1848_v1  ;;  %v451_v26 = vld [vmem:[#allocation5 + $0x68] sm:$0xff]  ;;  %1382 = vmatprep.subr.bf16.mxu0 %v1381_v18  ;;  %v450_v30 = vld [vmem:[#allocation5 + $0x60] sm:$0xff] }
  0x3d   :  { %v1385_v20 = vpack.c.bf16 %v448_v17, %v445_v16  ;;  %v100_v25 = vsub.s32 4, %v1848_v1  ;;  %1384 = vmatpush1.bf16.msra.mxu0 %v1383_v19  ;;  %v1387_v28 = vpack.c.bf16 %v447_v22, %v444_v21  ;;  %v1389_v29 = vpack.c.bf16 %v454_v27, %v451_v26  ;;  %v453_v31 = vld [vmem:[#allocation5 + $0x78] sm:$0xff]  ;;  %v460_v36 = vld [vmem:[#allocation5 + $0xb0] sm:$0xff]  ;;  %v491_v38 = vld [vmem:[#allocation5 + $0x1a8] sm:$0xff] }
  0x3e   :  { %v87_v7 = vrot.slane %v1853_v5, %v86_v2  ;;  %v73_v8 = vrot.slane %v1853_v5, %v72_v3  ;;  %v161_v13 = vrot.slane %v1858_v6, %v72_v3  ;;  %v80_v14 = vrot.slane %v1853_v5, %v79_v4  ;;  %v457_v35 = vld [vmem:[#allocation5 + $0x98] sm:$0xff]  ;;  %v488_v37 = vld [vmem:[#allocation5 + $0x190] sm:$0xff]  ;;  %v443_v42 = vld [vmem:[#allocation5 + $0x28] sm:$0xff] }
  0x3f   :  { %v94_v23 = vrot.slane %v1853_v5, %v93_v15  ;;  %v168_v24 = vrot.slane %v1858_v6, %v79_v4  ;;  %1386 = vmatprep.subr.bf16.mxu0 %v1385_v20  ;;  %v101_v32 = vrot.slane %v1853_v5, %v100_v25  ;;  %v175_v33 = vrot.slane %v1858_v6, %v86_v2  ;;  %v440_v41 = vld [vmem:[#allocation5 + $0x10] sm:$0xff]  ;;  %v459_v45 = vld [vmem:[#allocation5 + $0xa8] sm:$0xff]  ;;  %v494_v47 = vld [vmem:[#allocation5 + $0x1c0] sm:$0xff] }
  0x40   :  { %89 = vbcast.lane.b32.xlu1 %v87_v7, 256  ;;  %75 = vbcast.lane.b32.xlu0 %v73_v8, 256  ;;  %v107_v34 = vsub.s32 5, %v1848_v1  ;;  %v1391_v39 = vpack.c.bf16 %v453_v31, %v450_v30  ;;  %v1509_v40 = vpack.c.bf16 %v491_v38, %v488_v37  ;;  %v1393_v43 = vpack.c.bf16 %v460_v36, %v457_v35  ;;  %v456_v44 = vld [vmem:[#allocation5 + $0x90] sm:$0xff]  ;;  %v463_v51 = vld [vmem:[#allocation5 + $0xc8] sm:$0xff]  ;;  %v466_v52 = vld [vmem:[#allocation5 + $0xe0] sm:$0xff] }
  0x41   :  { %1388 = vmatpush1.bf16.msra.mxu0 %v1387_v28  ;;  %v1511_v46 = vpack.c.bf16 %v443_v42, %v440_v41  ;;  %v182_v49 = vrot.slane %v1858_v6, %v93_v15  ;;  %v114_v50 = vsub.s32 6, %v1848_v1  ;;  %v497_v53 = vld [vmem:[#allocation5 + $0x1d8] sm:$0xff]  ;;  %v446_v55 = vld [vmem:[#allocation5 + $0x40] sm:$0xff]  ;;  %v1395_v56 = vpack.c.bf16 %v459_v45, %v456_v44  ;;  %v472_v4 = vld [vmem:[#allocation5 + $0x110] sm:$0xff] }
  0x42   :  { %1390 = vmatprep.subr.bf16.mxu0 %v1389_v29  ;;  %v108_v48 = vrot.slane %v1853_v5, %v107_v34  ;;  %1510 = vmatprep.subr.bf16.mxu1 %v1509_v40  ;;  %v1513_v54 = vpack.c.bf16 %v497_v53, %v494_v47  ;;  %v449_v57 = vld [vmem:[#allocation5 + $0x58] sm:$0xff]  ;;  %v1397_v58 = vpack.c.bf16 %v466_v52, %v463_v51  ;;  %v462_v59 = vld [vmem:[#allocation5 + $0xc0] sm:$0xff]  ;;  %v121_v2 = vsub.s32 7, %v1848_v1  ;;  %v500_v7 = vld [vmem:[#allocation5 + $0x1f0] sm:$0xff] }
  0x43   :  { %1512 = vmatpush3.bf16.msra.mxu1 %v1511_v46  ;;  %v465_v60 = vld [vmem:[#allocation5 + $0xd8] sm:$0xff]  ;;  %v1515_v61 = vpack.c.bf16 %v449_v57, %v446_v55  ;;  %v115_v62 = vrot.slane %v1853_v5, %v114_v50  ;;  %v189_v63 = vrot.slane %v1858_v6, %v100_v25  ;;  %v503_v8 = vld [vmem:[#allocation5 + $0x208] sm:$0xff]  ;;  %v468_v12 = vld [vmem:[#allocation5 + $0xf0] sm:$0xff]  ;;  %v196_v15 = vrot.slane %v1858_v6, %v107_v34 }
  0x44   :  { %163 = vbcast.lane.b32.xlu1 %v161_v13, 256  ;;  %82 = vbcast.lane.b32.xlu0 %v80_v14, 256  ;;  %v469_v3 = vld [vmem:[#allocation5 + $0xf8] sm:$0xff]  ;;  %v1399_v9 = vpack.c.bf16 %v465_v60, %v462_v59  ;;  %v1517_v10 = vpack.c.bf16 %v503_v8, %v500_v7  ;;  %v471_v13 = vld [vmem:[#allocation5 + $0x108] sm:$0xff]  ;;  %v122_v14 = vrot.slane %v1853_v5, %v121_v2  ;;  %v478_v1 = vld [vmem:[#allocation5 + $0x140] sm:$0xff] }
  0x45   :  { %1392 = vmatpush1.bf16.msra.mxu0 %v1391_v39  ;;  %1514 = vmatprep.subr.bf16.mxu1 %v1513_v54  ;;  %v1401_v11 = vpack.c.bf16 %v472_v4, %v469_v3  ;;  %v475_v16 = vld [vmem:[#allocation5 + $0x128] sm:$0xff]  ;;  %v452_v17 = vld [vmem:[#allocation5 + $0x70] sm:$0xff]  ;;  %v1403_v19 = vpack.c.bf16 %v471_v13, %v468_v12  ;;  %v474_v22 = vld [vmem:[#allocation5 + $0x120] sm:$0xff]  ;;  %v210_v25 = vrot.slane %v1858_v6, %v121_v2 }
  0x46   :  { %1394 = vmatprep.subr.bf16.mxu0 %v1393_v43  ;;  %v455_v18 = vld [vmem:[#allocation5 + $0x88] sm:$0xff]  ;;  %v1405_v21 = vpack.c.bf16 %v478_v1, %v475_v16  ;;  %v203_v5 = vrot.slane %v1858_v6, %v114_v50  ;;  %v481_v26 = vld [vmem:[#allocation5 + $0x158] sm:$0xff]  ;;  %v484_v27 = vld [vmem:[#allocation5 + $0x170] sm:$0xff] }
  0x47   :  { %1516 = vmatpush3.bf16.msra.mxu1 %v1515_v61  ;;  %v1519_v20 = vpack.c.bf16 %v455_v18, %v452_v17  ;;  %v509_v28 = vld [vmem:[#allocation5 + $0x238] sm:$0xff]  ;;  %v1409_v31 = vpack.c.bf16 %v484_v27, %v481_v26  ;;  %v458_v34 = vld [vmem:[#allocation5 + $0xa0] sm:$0xff]  ;;  %v487_v35 = vld [vmem:[#allocation5 + $0x188] sm:$0xff] }
  0x48   :  { %96 = vbcast.lane.b32.xlu1 %v94_v23, 256  ;;  %170 = vbcast.lane.b32.xlu0 %v168_v24, 256  ;;  %v477_v23 = vld [vmem:[#allocation5 + $0x138] sm:$0xff]  ;;  %v506_v24 = vld [vmem:[#allocation5 + $0x220] sm:$0xff]  ;;  %v512_v39 = vld [vmem:[#allocation5 + $0x250] sm:$0xff] }
  0x49   :  { %1396 = vmatpush1.bf16.msra.mxu0 %v1395_v56  ;;  %1518 = vmatprep.subr.bf16.mxu1 %v1517_v10  ;;  %v1521_v29 = vpack.c.bf16 %v509_v28, %v506_v24  ;;  %v1407_v30 = vpack.c.bf16 %v477_v23, %v474_v22  ;;  %v490_v36 = vld [vmem:[#allocation5 + $0x1a0] sm:$0xff]  ;;  %v461_v37 = vld [vmem:[#allocation5 + $0xb8] sm:$0xff]  ;;  %v515_v43 = vld [vmem:[#allocation5 + $0x268] sm:$0xff] }
  0x4a   :  { %1398 = vmatprep.subr.bf16.mxu0 %v1397_v58  ;;  %v1523_v38 = vpack.c.bf16 %v461_v37, %v458_v34  ;;  %v1413_v40 = vpack.c.bf16 %v490_v36, %v487_v35  ;;  %v486_v41 = vld [vmem:[#allocation5 + $0x180] sm:$0xff]  ;;  %v489_v42 = vld [vmem:[#allocation5 + $0x198] sm:$0xff]  ;;  %v496_v45 = vld [vmem:[#allocation5 + $0x1d0] sm:$0xff]  ;;  %v1525_v46 = vpack.c.bf16 %v515_v43, %v512_v39 }
  0x4b   :  { %1520 = vmatpush3.bf16.msra.mxu1 %v1519_v20  ;;  %v493_v44 = vld [vmem:[#allocation5 + $0x1b8] sm:$0xff]  ;;  %v1415_v47 = vpack.c.bf16 %v489_v42, %v486_v41  ;;  %v495_v50 = vld [vmem:[#allocation5 + $0x1c8] sm:$0xff]  ;;  %v502_v52 = vld [vmem:[#allocation5 + $0x200] sm:$0xff] }
  0x4c   :  { %103 = vbcast.lane.b32.xlu1 %v101_v32, 256  ;;  %177 = vbcast.lane.b32.xlu0 %v175_v33, 256  ;;  %v480_v32 = vld [vmem:[#allocation5 + $0x150] sm:$0xff]  ;;  %v483_v33 = vld [vmem:[#allocation5 + $0x168] sm:$0xff]  ;;  %v498_v55 = vld [vmem:[#allocation5 + $0x1e0] sm:$0xff] }
  0x4d   :  { %1400 = vmatpush1.bf16.msra.mxu0 %v1399_v9  ;;  %1522 = vmatprep.subr.bf16.mxu1 %v1521_v29  ;;  %v1411_v6 = vpack.c.bf16 %v483_v33, %v480_v32  ;;  %v499_v51 = vld [vmem:[#allocation5 + $0x1e8] sm:$0xff]  ;;  %v501_v56 = vld [vmem:[#allocation5 + $0x1f8] sm:$0xff]  ;;  %v464_v57 = vld [vmem:[#allocation5 + $0xd0] sm:$0xff] }
  0x4e   :  { %1402 = vmatprep.subr.bf16.mxu0 %v1401_v11  ;;  %v1421_v54 = vpack.c.bf16 %v502_v52, %v499_v51  ;;  %v505_v58 = vld [vmem:[#allocation5 + $0x218] sm:$0xff]  ;;  %v508_v59 = vld [vmem:[#allocation5 + $0x230] sm:$0xff]  ;;  %v467_v60 = vld [vmem:[#allocation5 + $0xe8] sm:$0xff] }
  0x4f   :  { %1524 = vmatpush3.bf16.msra.mxu1 %v1523_v38  ;;  %v1527_v61 = vpack.c.bf16 %v467_v60, %v464_v57  ;;  %v518_v2 = vld [vmem:[#allocation5 + $0x280] sm:$0xff]  ;;  %v1425_v3 = vpack.c.bf16 %v508_v59, %v505_v58  ;;  %v507_v4 = vld [vmem:[#allocation5 + $0x228] sm:$0xff]  ;;  %v521_v8 = vld [vmem:[#allocation5 + $0x298] sm:$0xff] }
  0x50   :  { %110 = vbcast.lane.b32.xlu1 %v108_v48, 256  ;;  %184 = vbcast.lane.b32.xlu0 %v182_v49, 256  ;;  %v1417_v48 = vpack.c.bf16 %v496_v45, %v493_v44  ;;  %v492_v49 = vld [vmem:[#allocation5 + $0x1b0] sm:$0xff]  ;;  %v511_v7 = vld [vmem:[#allocation5 + $0x248] sm:$0xff]  ;;  %v514_v9 = vld [vmem:[#allocation5 + $0x260] sm:$0xff]  ;;  %v1529_v10 = vpack.c.bf16 %v521_v8, %v518_v2 }
  0x51   :  { %1404 = vmatpush1.bf16.msra.mxu0 %v1403_v19  ;;  %1526 = vmatprep.subr.bf16.mxu1 %v1525_v46  ;;  %v1419_v53 = vpack.c.bf16 %v495_v50, %v492_v49  ;;  %v470_v11 = vld [vmem:[#allocation5 + $0x100] sm:$0xff]  ;;  %v473_v12 = vld [vmem:[#allocation5 + $0x118] sm:$0xff]  ;;  %v524_v16 = vld [vmem:[#allocation5 + $0x2b0] sm:$0xff]  ;;  %v1429_v1 = vpack.c.bf16 %v514_v9, %v511_v7 }
  0x52   :  { %1406 = vmatprep.subr.bf16.mxu0 %v1405_v21  ;;  %v1531_v13 = vpack.c.bf16 %v473_v12, %v470_v11  ;;  %v513_v17 = vld [vmem:[#allocation5 + $0x258] sm:$0xff]  ;;  %v527_v19 = vld [vmem:[#allocation5 + $0x2c8] sm:$0xff]  ;;  %v520_v20 = vld [vmem:[#allocation5 + $0x290] sm:$0xff] }
  0x53   :  { %1528 = vmatpush3.bf16.msra.mxu1 %v1527_v61  ;;  %v517_v18 = vld [vmem:[#allocation5 + $0x278] sm:$0xff]  ;;  %v1533_v21 = vpack.c.bf16 %v527_v19, %v524_v16  ;;  %v476_v22 = vld [vmem:[#allocation5 + $0x130] sm:$0xff]  ;;  %v479_v23 = vld [vmem:[#allocation5 + $0x148] sm:$0xff] }
  0x54   :  { %117 = vbcast.lane.b32.xlu1 %v115_v62, 256  ;;  %191 = vbcast.lane.b32.xlu0 %v189_v63, 256  ;;  %v1423_v62 = vpack.c.bf16 %v501_v56, %v498_v55  ;;  %v504_v63 = vld [vmem:[#allocation5 + $0x210] sm:$0xff]  ;;  %v1535_v24 = vpack.c.bf16 %v479_v23, %v476_v22  ;;  %v530_v26 = vld [vmem:[#allocation5 + $0x2e0] sm:$0xff]  ;;  %v1433_v27 = vpack.c.bf16 %v520_v20, %v517_v18  ;;  %v519_v28 = vld [vmem:[#allocation5 + $0x288] sm:$0xff] }
  0x55   :  { %1408 = vmatpush1.bf16.msra.mxu0 %v1407_v30  ;;  %1530 = vmatprep.subr.bf16.mxu1 %v1529_v10  ;;  %v523_v29 = vld [vmem:[#allocation5 + $0x2a8] sm:$0xff]  ;;  %v533_v30 = vld [vmem:[#allocation5 + $0x2f8] sm:$0xff]  ;;  %v482_v33 = vld [vmem:[#allocation5 + $0x160] sm:$0xff] }
  0x56   :  { %1410 = vmatprep.subr.bf16.mxu0 %v1409_v31  ;;  %v526_v31 = vld [vmem:[#allocation5 + $0x2c0] sm:$0xff]  ;;  %v1537_v32 = vpack.c.bf16 %v533_v30, %v530_v26  ;;  %v485_v34 = vld [vmem:[#allocation5 + $0x178] sm:$0xff]  ;;  %v584_v41 = vld [vmem:[#allocation5 + $0x490] sm:$0xff] }
  0x57   :  { %1532 = vmatpush3.bf16.msra.mxu1 %v1531_v13  ;;  %v1539_v35 = vpack.c.bf16 %v485_v34, %v482_v33  ;;  %v1437_v37 = vpack.c.bf16 %v526_v31, %v523_v29  ;;  %v522_v38 = vld [vmem:[#allocation5 + $0x2a0] sm:$0xff]  ;;  %v529_v39 = vld [vmem:[#allocation5 + $0x2d8] sm:$0xff]  ;;  %v587_v42 = vld [vmem:[#allocation5 + $0x4a8] sm:$0xff] }
  0x58   :  { %124 = vbcast.lane.b32.xlu1 %v122_v14, 256  ;;  %198 = vbcast.lane.b32.xlu0 %v196_v15, 256  ;;  %v1427_v14 = vpack.c.bf16 %v507_v4, %v504_v63  ;;  %v510_v15 = vld [vmem:[#allocation5 + $0x240] sm:$0xff]  ;;  %v1541_v44 = vpack.c.bf16 %v587_v42, %v584_v41  ;;  %v528_v46 = vld [vmem:[#allocation5 + $0x2d0] sm:$0xff]  ;;  %v1904_v4 = vld [vmem:[#allocation5 + $0x318] sm:$0xff] }
  0x59   :  { %1412 = vmatpush1.bf16.msra.mxu0 %v1411_v6  ;;  %1534 = vmatprep.subr.bf16.mxu1 %v1533_v21  ;;  %v525_v6 = vld [vmem:[#allocation5 + $0x2b8] sm:$0xff]  ;;  %v538_v49 = vld [vmem:[#allocation5 + $0x320] sm:$0xff]  ;;  %v1906_v7 = vld [vmem:[#allocation5 + $0x310] sm:$0xff] }
  0x5a   :  { %1414 = vmatprep.subr.bf16.mxu0 %v1413_v40  ;;  %v532_v40 = vld [vmem:[#allocation5 + $0x2f0] sm:$0xff]  ;;  %v1439_v43 = vpack.c.bf16 %v525_v6, %v522_v38  ;;  %v1908_v10 = vld [vmem:[#allocation5 + $0x328] sm:$0xff]  ;;  %v1910_v11 = vld [vmem:[#allocation5 + $0x338] sm:$0xff] }
  0x5b   :  { %1536 = vmatpush3.bf16.msra.mxu1 %v1535_v24  ;;  %v1441_v45 = vpack.c.bf16 %v532_v40, %v529_v39  ;;  %v1912_v12 = vld [vmem:[#allocation5 + $0x350] sm:$0xff]  ;;  %v1929_v19 = vld [vmem:[#allocation5 + $0x348] sm:$0xff]  ;;  %v1931_v20 = vld [vmem:[#allocation5 + $0x340] sm:$0xff] }
  0x5c   :  { %212 = vbcast.lane.b32.xlu1 %v210_v25, 256  ;;  %205 = vbcast.lane.b32.xlu0 %v203_v5, 256  ;;  %v1431_v25 = vpack.c.bf16 %v513_v17, %v510_v15  ;;  %v516_v5 = vld [vmem:[#allocation5 + $0x270] sm:$0xff]  ;;  %v1916_v15 = vld [vmem:[#allocation5 + $0x4d8] sm:$0xff]  ;;  %2229 = vst [vmem:[#allocation18_spill] sm:$0xff] %v1929_v19  ;;  %2230 = vst [vmem:[#allocation19_spill] sm:$0xff] %v1931_v20 }
  0x5d   :  { %1416 = vmatpush1.bf16.msra.mxu0 %v1415_v47  ;;  %v1435_v36 = vpack.c.bf16 %v519_v28, %v516_v5  ;;  %1538 = vmatprep.subr.bf16.mxu1 %v1537_v32  ;;  %v531_v47 = vld [vmem:[#allocation5 + $0x2e8] sm:$0xff]  ;;  %2227 = vst [vmem:[#allocation16_spill] sm:$0xff] %v1916_v15  ;;  %v1918_v16 = vld [vmem:[#allocation5 + $0x330] sm:$0xff]  ;;  %v1933_v21 = vld [vmem:[#allocation5 + $0x358] sm:$0xff] }
  0x5e   :  { %1418 = vmatprep.subr.bf16.mxu0 %v1417_v48  ;;  %v535_v48 = vld [vmem:[#allocation5 + $0x308] sm:$0xff]  ;;  %v1443_v50 = vpack.c.bf16 %v531_v47, %v528_v46  ;;  %2228 = vst [vmem:[#allocation17_spill] sm:$0xff] %v1918_v16  ;;  %2231 = vst [vmem:[#allocation20_spill] sm:$0xff] %v1933_v21 }
  0x5f   :  { %1540 = vmatpush3.bf16.msra.mxu1 %v1539_v35  ;;  %v1445_v51 = vpack.c.bf16 %v538_v49, %v535_v48 }
  0x60   :  { %1542 = vmatprep.subr.bf16.mxu1 %v1541_v44 }
  0x61   :  { %1420 = vmatpush1.bf16.msra.mxu0 %v1419_v53 }
  0x62   :  { %1422 = vmatprep.subr.bf16.mxu0 %v1421_v54  ;;  %v1884_v54 = vand.u32 127, %v65_v0 }
  0x64   :  { %v1887_v55 = vadd.s32 128, %v1884_v54  ;;  %v1892_v58 = vadd.s32 384, %v1884_v54 }
  0x65   :  { %1424 = vmatpush1.bf16.msra.mxu0 %v1423_v62 }
  0x66   :  { %1426 = vmatprep.subr.bf16.mxu0 %v1425_v3  ;;  %v1902_v3 = vld [vmem:[#allocation5 + $0x300] sm:$0xff] }
  0x69   :  { %1428 = vmatpush1.bf16.msra.mxu0 %v1427_v14  ;;  %v1914_v14 = vld [vmem:[#allocation5 + $0x4c0] sm:$0xff] }
  0x6a   :  { %1430 = vmatprep.subr.bf16.mxu0 %v1429_v1  ;;  %2226 = vst [vmem:[#allocation15_spill] sm:$0xff] %v1914_v14  ;;  %v1921_v1 = vadd.s32 256, %v1884_v54 }
  0x6d   :  { %1432 = vmatpush1.bf16.msra.mxu0 %v1431_v25 }
  0x6e   :  { %1434 = vmatprep.subr.bf16.mxu0 %v1433_v27 }
  0x71   :  { %1436 = vmatpush1.bf16.msra.mxu0 %v1435_v36 }
  0x72   :  { %1438 = vmatprep.subr.bf16.mxu0 %v1437_v37 }
  0x75   :  { %1440 = vmatpush1.bf16.msra.mxu0 %v1439_v43 }
  0x76   :  { %1442 = vmatprep.subr.bf16.mxu0 %v1441_v45 }
  0x79   :  { %1444 = vmatpush1.bf16.msra.mxu0 %v1443_v50 }
  0x7a   :  { %1446 = vmatprep.subr.bf16.mxu0 %v1445_v51 }
  0xb2   :  { %v1881_v52 = vpop.permute.xlu1 %89  ;;  %v76_v53 = vpop.permute.xlu0 %75 }
  0xb3   :  { %vm126_vm0 = vcmp.eq.s32.totalorder %v1884_v54, %v76_v53  ;;  %vm127_vm1 = vcmp.eq.s32.totalorder %v1887_v55, %v76_v53  ;;  %vm129_vm2 = vcmp.eq.s32.totalorder %v1892_v58, %v76_v53  ;;  %vm134_vm6 = vcmp.eq.s32.totalorder %v1884_v54, %v1881_v52 }
  0xb4   :  { %vm128_vm7 = vcmp.eq.s32.totalorder %v1921_v1, %v76_v53  ;;  %vm135_vm8 = vcmp.eq.s32.totalorder %v1887_v55, %v1881_v52  ;;  %vm137_vm9 = vcmp.eq.s32.totalorder %v1892_v58, %v1881_v52  ;;  %vm136_vm14 = vcmp.eq.s32.totalorder %v1921_v1, %v1881_v52 }
  0xb6   :  { %v164_v56 = vpop.permute.xlu1 %163  ;;  %v1889_v57 = vpop.permute.xlu0 %82 }
  0xb7   :  { %v214_v59 = vsel %vm126_vm0, %v164_v56, 0.0  ;;  %v215_v60 = vsel %vm127_vm1, %v164_v56, 0.0  ;;  %v217_v62 = vsel %vm129_vm2, %v164_v56, 0.0  ;;  %vm130_vm3 = vcmp.eq.s32.totalorder %v1884_v54, %v1889_v57 }
  0xb8   :  { %v246_v61 = vrot.slane %v214_v59, 4  ;;  %v252_v63 = vrot.slane %v215_v60, 4  ;;  %v264_v9 = vrot.slane %v217_v62, 4  ;;  %vm131_vm4 = vcmp.eq.s32.totalorder %v1887_v55, %v1889_v57 }
  0xb9   :  { %vm133_vm5 = vcmp.eq.s32.totalorder %v1892_v58, %v1889_v57  ;;  %v1958_v36 = vsel %vm128_vm7, %v164_v56, 0.0  ;;  %vm132_vm10 = vcmp.eq.s32.totalorder %v1921_v1, %v1889_v57 }
  0xba   :  { %v1897_v0 = vpop.permute.xlu0 %170  ;;  %v247_v8 = vadd.f32 %v246_v61, %v214_v59  ;;  %v253_v13 = vadd.f32 %v252_v63, %v215_v60  ;;  %v1935_v22 = vpop.permute.xlu1 %96  ;;  %v265_v27 = vadd.f32 %v264_v9, %v217_v62  ;;  %2232 = vst [vmem:[#allocation21_spill] sm:$0xff] %v1958_v36 }
  0xbb   :  { %v218_v2 = vsel %vm130_vm3, %v1897_v0, 0.0  ;;  %v219_v23 = vsel %vm131_vm4, %v1897_v0, 0.0  ;;  %v221_v24 = vsel %vm133_vm5, %v1897_v0, 0.0  ;;  %vm138_vm11 = vcmp.eq.s32.totalorder %v1884_v54, %v1935_v22 }
  0xbc   :  { %v270_v17 = vrot.slane %v218_v2, 4  ;;  %v248_v26 = vrot.slane %v247_v8, 2  ;;  %v254_v30 = vrot.slane %v253_v13, 2  ;;  %v276_v34 = vrot.slane %v219_v23, 4 }
  0xbd   :  { %v288_v35 = vrot.slane %v221_v24, 4  ;;  %v266_v38 = vrot.slane %v265_v27, 2  ;;  %vm139_vm12 = vcmp.eq.s32.totalorder %v1887_v55, %v1935_v22  ;;  %vm141_vm13 = vcmp.eq.s32.totalorder %v1892_v58, %v1935_v22 }
  0xbe   :  { %v1927_v18 = vpop.permute.xlu0 %177  ;;  %v271_v33 = vadd.f32 %v270_v17, %v218_v2  ;;  %v249_v37 = vadd.f32 %v248_v26, %v247_v8  ;;  %v255_v41 = vadd.f32 %v254_v30, %v253_v13  ;;  %v1970_v42 = vpop.permute.xlu1 %103  ;;  %v277_v45 = vadd.f32 %v276_v34, %v219_v23 }
  0xbf   :  { %v222_v6 = vsel %vm134_vm6, %v1927_v18, 0.0  ;;  %v223_v39 = vsel %vm135_vm8, %v1927_v18, 0.0  ;;  %v225_v43 = vsel %vm137_vm9, %v1927_v18, 0.0  ;;  %v289_v46 = vadd.f32 %v288_v35, %v221_v24 }
  0xc0   :  { %v272_v44 = vrot.slane %v271_v33, 2  ;;  %v294_v47 = vrot.slane %v222_v6, 4  ;;  %v300_v48 = vrot.slane %v223_v39, 4  ;;  %v250_v51 = vrot.slane %v249_v37, 1 }
  0xc1   :  { %v267_v53 = vadd.f32 %v266_v38, %v265_v27  ;;  %v1981_v56 = vsel %vm132_vm10, %v1897_v0, 0.0  ;;  %v312_v59 = vrot.slane %v225_v43, 4  ;;  %v256_v60 = vrot.slane %v255_v41, 1 }
  0xc2   :  { %v1964_v40 = vpop.permute.xlu0 %184  ;;  %2233 = vst [vmem:[#allocation22_spill] sm:$0xff] %v1981_v56  ;;  %v278_v8 = vrot.slane %v277_v45, 2  ;;  %v290_v9 = vrot.slane %v289_v46, 2  ;;  %v273_v13 = vadd.f32 %v272_v44, %v271_v33  ;;  %v295_v17 = vadd.f32 %v294_v47, %v222_v6  ;;  %v1987_v24 = vpop.permute.xlu1 %110 }
  0xc3   :  { %v226_v49 = vsel %vm138_vm11, %v1964_v40, 0.0  ;;  %v227_v50 = vsel %vm139_vm12, %v1964_v40, 0.0  ;;  %v229_v61 = vsel %vm141_vm13, %v1964_v40, 0.0  ;;  %v301_v23 = vadd.f32 %v300_v48, %v223_v39 }
  0xc4   :  { %v318_v62 = vrot.slane %v226_v49, 4  ;;  %v324_v63 = vrot.slane %v227_v50, 4  ;;  %v336_v57 = vrot.slane %v229_v61, 4  ;;  %v1989_v0 = vadd.f32 %v250_v51, %v249_v37 }
  0xc5   :  { %v268_v26 = vrot.slane %v267_v53, 1  ;;  %v313_v30 = vadd.f32 %v312_v59, %v225_v43  ;;  %v1994_v35 = vadd.f32 %v256_v60, %v255_v41  ;;  %vm142_vm15 = vcmp.eq.s32.totalorder %v1884_v54, %v1970_v42 }
  0xc6   :  { %v1992_v34 = vpop.permute.xlu0 %191  ;;  %v319_v38 = vadd.f32 %v318_v62, %v226_v49  ;;  %v325_v33 = vadd.f32 %v324_v63, %v227_v50  ;;  %v279_v6 = vadd.f32 %v278_v8, %v277_v45  ;;  %vm143_vm0 = vcmp.eq.s32.totalorder %v1887_v55, %v1970_v42 }
  0xc7   :  { %vm145_vm1 = vcmp.eq.s32.totalorder %v1892_v58, %v1970_v42  ;;  %v337_v37 = vadd.f32 %v336_v57, %v229_v61  ;;  %v274_v39 = vrot.slane %v273_v13, 1  ;;  %v291_v44 = vadd.f32 %v290_v9, %v289_v46  ;;  %v2013_v46 = vpop.permute.xlu1 %117 }
  0xc8   :  { %v296_v43 = vrot.slane %v295_v17, 2  ;;  %v302_v47 = vrot.slane %v301_v23, 2  ;;  %v314_v48 = vrot.slane %v313_v30, 2  ;;  %v230_v41 = vsel %vm142_vm15, %v1992_v34, 0.0 }
  0xc9   :  { %v231_v51 = vsel %vm143_vm0, %v1992_v34, 0.0  ;;  %v233_v49 = vsel %vm145_vm1, %v1992_v34, 0.0  ;;  %v2005_v50 = vadd.f32 %v268_v26, %v267_v53  ;;  %v2011_v45 = vsel %vm136_vm14, %v1927_v18, 0.0 }
  0xca   :  { %v320_v59 = vrot.slane %v319_v38, 2  ;;  %v326_v60 = vrot.slane %v325_v33, 2  ;;  %vm140_vm2 = vcmp.eq.s32.totalorder %v1921_v1, %v1935_v22  ;;  %v338_v61 = vrot.slane %v337_v37, 2  ;;  %v2017_v9 = vpop.permute.xlu0 %198 }
  0xcb   :  { %v342_v62 = vrot.slane %v230_v41, 4  ;;  %v348_v63 = vrot.slane %v231_v51, 4  ;;  %v360_v8 = vrot.slane %v233_v49, 4  ;;  %v280_v53 = vrot.slane %v279_v6, 1 }
  0xcc   :  { %v292_v57 = vrot.slane %v291_v44, 1  ;;  %v297_v26 = vadd.f32 %v296_v43, %v295_v17  ;;  %v303_v32 = vadd.f32 %v302_v47, %v301_v23  ;;  %v2019_v52 = vadd.f32 %v274_v39, %v273_v13 }
  0xcd   :  { %v315_v18 = vadd.f32 %v314_v48, %v313_v30  ;;  %vm147_vm3 = vcmp.eq.s32.totalorder %v1887_v55, %v1987_v24  ;;  %v343_v31 = vadd.f32 %v342_v62, %v230_v41  ;;  %vm146_vm4 = vcmp.eq.s32.totalorder %v1884_v54, %v1987_v24  ;;  %v2029_v30 = vpop.permute.xlu1 %124 }
  0xce   :  { %v321_v2 = vadd.f32 %v320_v59, %v319_v38  ;;  %v349_v27 = vadd.f32 %v348_v63, %v231_v51  ;;  %v235_v29 = vsel %vm147_vm3, %v2017_v9, 0.0  ;;  %v327_v28 = vadd.f32 %v326_v60, %v325_v33  ;;  %2234 = vst [vmem:[#allocation23_spill] sm:$0xff] %v2029_v30 }
  0xcf   :  { %v339_v5 = vadd.f32 %v338_v61, %v337_v37  ;;  %v361_v25 = vadd.f32 %v360_v8, %v233_v49  ;;  %v234_v17 = vsel %vm146_vm4, %v2017_v9, 0.0  ;;  %v298_v23 = vrot.slane %v297_v26, 1 }
  0xd0   :  { %v304_v13 = vrot.slane %v303_v32, 1  ;;  %vm149_vm5 = vcmp.eq.s32.totalorder %v1892_v58, %v1987_v24  ;;  %v372_v39 = vrot.slane %v235_v29, 4  ;;  %v2031_v43 = vadd.f32 %v280_v53, %v279_v6 }
  0xd1   :  { %v316_v47 = vrot.slane %v315_v18, 1  ;;  %v344_v38 = vrot.slane %v343_v31, 2  ;;  %v237_v48 = vsel %vm149_vm5, %v2017_v9, 0.0  ;;  %v2034_v41 = vadd.f32 %v292_v57, %v291_v44  ;;  %v2056_v22 = vpop.permute.xlu1 %212 }
  0xd2   :  { %v322_v33 = vrot.slane %v321_v2, 1  ;;  %v350_v37 = vrot.slane %v349_v27, 2  ;;  %v366_v51 = vrot.slane %v234_v17, 4  ;;  %v328_v49 = vrot.slane %v327_v28, 1  ;;  %2235 = vst [vmem:[#allocation24_spill] sm:$0xff] %v2056_v22 }
  0xd3   :  { %v340_v59 = vrot.slane %v339_v5, 1  ;;  %v362_v60 = vrot.slane %v361_v25, 2  ;;  %v373_v61 = vadd.f32 %v372_v39, %v235_v29  ;;  %v2036_v62 = vadd.f32 %v298_v23, %v297_v26 }
  0xd4   :  { %v2038_v63 = vadd.f32 %v304_v13, %v303_v32  ;;  %v2044_v6 = vsel %vm140_vm2, %v1964_v40, 0.0  ;;  %v384_v8 = vrot.slane %v237_v48, 4  ;;  %v2046_v44 = vadd.f32 %v316_v47, %v315_v18 }
  0xd5   :  { %vm150_vm6 = vcmp.eq.s32.totalorder %v1884_v54, %v2013_v46  ;;  %vm151_vm7 = vcmp.eq.s32.totalorder %v1887_v55, %v2013_v46  ;;  %v345_v29 = vadd.f32 %v344_v38, %v343_v31  ;;  %v2052_v53 = vadd.f32 %v322_v33, %v321_v2  ;;  %v2068_v31 = vpop.permute.xlu0 %205 }
  0xd6   :  { %vm153_vm8 = vcmp.eq.s32.totalorder %v1892_v58, %v2013_v46  ;;  %v351_v32 = vadd.f32 %v350_v37, %v349_v27  ;;  %v367_v57 = vadd.f32 %v366_v51, %v234_v17  ;;  %v2058_v40 = vadd.f32 %v328_v49, %v327_v28 }
  0xd7   :  { %v2060_v26 = vadd.f32 %v340_v59, %v339_v5  ;;  %v363_v18 = vadd.f32 %v362_v60, %v361_v25  ;;  %v374_v23 = vrot.slane %v373_v61, 2  ;;  %vm662_vm9 = vcmask 1041409  }
  0xd8   :  { %v385_v13 = vadd.f32 %v384_v8, %v237_v48  ;;  %vm154_vm10 = vcmp.eq.s32.totalorder %v1884_v54, %v2029_v30  ;;  %vm155_vm11 = vcmp.eq.s32.totalorder %v1887_v55, %v2029_v30  ;;  %vm157_vm12 = vcmp.eq.s32.totalorder %v1892_v58, %v2029_v30 }
  0xd9   :  { %v346_v2 = vrot.slane %v345_v29, 1  ;;  %v242_v28 = vsel %vm154_vm10, %v2056_v22, 0.0  ;;  %v243_v5 = vsel %vm155_vm11, %v2056_v22, 0.0  ;;  %v245_v25 = vsel %vm157_vm12, %v2056_v22, 0.0 }
  0xda   :  { %vm664_vm13 = vcmask 1042434   ;;  %v352_v27 = vrot.slane %v351_v32, 1  ;;  %v368_v17 = vrot.slane %v367_v57, 2  ;;  %v414_v39 = vrot.slane %v242_v28, 4 }
  0xdb   :  { %v420_v47 = vrot.slane %v243_v5, 4  ;;  %vm666_vm14 = vcmask 1043459   ;;  %v375_v38 = vadd.f32 %v374_v23, %v373_v61  ;;  %v432_v48 = vrot.slane %v245_v25, 4 }
  0xdc   :  { %v238_v33 = vsel %vm150_vm6, %v2068_v31, 0.0  ;;  %v239_v37 = vsel %vm151_vm7, %v2068_v31, 0.0  ;;  %vm668_vm15 = vcmask 1044484   ;;  %v386_v51 = vrot.slane %v385_v13, 2 }
  0xdd   :  { %v415_v49 = vadd.f32 %v414_v39, %v242_v28  ;;  %v421_v59 = vadd.f32 %v420_v47, %v243_v5  ;;  %v241_v60 = vsel %vm153_vm8, %v2068_v31, 0.0  ;;  %vm670_vm0 = vcmask 1045509  }
  0xde   :  { %v364_v61 = vrot.slane %v363_v18, 1  ;;  %v433_v8 = vadd.f32 %v432_v48, %v245_v25  ;;  %v390_v23 = vrot.slane %v238_v33, 4  ;;  %v396_v54 = vrot.slane %v239_v37, 4 }
  0xdf   :  { %v369_v20 = vadd.f32 %v368_v17, %v367_v57  ;;  %v416_v21 = vrot.slane %v415_v49, 2  ;;  %v422_v16 = vrot.slane %v421_v59, 2  ;;  %v408_v19 = vrot.slane %v241_v60, 4 }
  0xe0   :  { %vm672_vm1 = vcmask 1046534   ;;  %v347_v55 = vadd.f32 %v346_v2, %v345_v29  ;;  %v376_v36 = vrot.slane %v375_v38, 1  ;;  %v391_v22 = vadd.f32 %v390_v23, %v238_v33 }
  0xe1   :  { %v397_v28 = vadd.f32 %v396_v54, %v239_v37  ;;  %vm674_vm2 = vcmask 1047559   ;;  %v387_v5 = vadd.f32 %v386_v51, %v385_v13  ;;  %v423_v39 = vadd.f32 %v422_v16, %v421_v59 }
  0xe2   :  { %v434_v47 = vrot.slane %v433_v8, 2  ;;  %v409_v58 = vadd.f32 %v408_v19, %v241_v60  ;;  %v353_v30 = vadd.f32 %v352_v27, %v351_v32  ;;  %v365_v56 = vadd.f32 %v364_v61, %v363_v18 }
  0xe3   :  { %v392_v14 = vrot.slane %v391_v22, 2  ;;  %v398_v25 = vrot.slane %v397_v28, 2  ;;  %v370_v48 = vrot.slane %v369_v20, 1  ;;  %v417_v15 = vadd.f32 %v416_v21, %v415_v49 }
  0xe4   :  { %v410_v57 = vrot.slane %v409_v58, 2  ;;  %v424_v17 = vrot.slane %v423_v39, 1  ;;  %vm144_vm3 = vcmp.eq.s32.totalorder %v1921_v1, %v1970_v42  ;;  %v377_v33 = vadd.f32 %v376_v36, %v375_v38 }
  0xe5   :  { %v393_v29 = vadd.f32 %v392_v14, %v391_v22  ;;  %v399_v2 = vadd.f32 %v398_v25, %v397_v28  ;;  %v676_v16 = vsel %vm662_vm9, %v2031_v43, %v1994_v35  ;;  %v388_v13 = vrot.slane %v387_v5, 1  ;;  %v547_v28 = vld [vmem:[#allocation5 + $0x368] sm:$0xff] }
  0xe6   :  { %v435_v19 = vadd.f32 %v434_v47, %v433_v8  ;;  %v411_v32 = vadd.f32 %v410_v57, %v409_v58  ;;  %v677_v18 = vsel %vm664_vm13, %v2038_v63, %v676_v16  ;;  %v425_v21 = vadd.f32 %v424_v17, %v423_v39  ;;  %v596_v39 = vld [vmem:[#allocation5 + $0x4f0] sm:$0xff]  ;;  %v599_v47 = vld [vmem:[#allocation5 + $0x508] sm:$0xff]  ;;  %v1645_v57 = vld [vmem:[%s2211_s4] sm:$0xff]  ;;  %s1774_s4 = smov [#allocation8]  }
  0xe7   :  { %v400_v27 = vrot.slane %v399_v2, 1  ;;  %v678_v37 = vsel %vm666_vm14, %v2058_v40, %v677_v18  ;;  %v394_v51 = vrot.slane %v393_v29, 1  ;;  %v371_v22 = vadd.f32 %v370_v48, %v369_v20  ;;  %v546_v48 = vld [vmem:[#allocation5 + $0x360] sm:$0xff]  ;;  %v548_v16 = vld [vmem:[#allocation5 + $0x370] sm:$0xff]  ;;  %s1199_s14 = sshll.u32 %s1774_s4, 4  ;;  %s1200_s14 = int_to_ptr.vmem [resolvable:$true] %s1199_s14 }
  0xe8   :  { %v679_v14 = vsel %vm668_vm15, %v353_v30, %v678_v37  ;;  %v418_v36 = vrot.slane %v417_v15, 1  ;;  %v663_v35 = vsel %vm662_vm9, %v2019_v52, %v1989_v0  ;;  %v389_v60 = vadd.f32 %v388_v13, %v387_v5  ;;  %v550_v5 = vld [vmem:[#allocation5 + $0x380] sm:$0xff]  ;;  %v551_v13 = vld [vmem:[#allocation5 + $0x388] sm:$0xff]  ;;  %s1712_s15 = scalar_lea.vmem %s1200_s14, 384  ;;  %p1717_p11 = scmp.lt.s32.totalorder %s1200_s14, %s1200_s14 }
  0xe9   :  { %v401_v43 = vadd.f32 %v400_v27, %v399_v2  ;;  %v680_v38 = vsel %vm670_vm0, %v377_v33, %v679_v14  ;;  %v395_v49 = vadd.f32 %v394_v51, %v393_v29  ;;  %v665_v63 = vsel %vm664_vm13, %v2036_v62, %v663_v35  ;;  %v2244_v37 = vld [vmem:[#allocation23_spill] sm:$0xff]  ;;  %v605_v51 = vld [vmem:[#allocation5 + $0x538] sm:$0xff]  ;;  %p1713_p10 = scmp.ne.s32.totalorder %s1200_s14, %s1712_s15  ;;  %p1718_p12 = scmp.lt.s32.totalorder %s1712_s15, %s1712_s15 }
  0xea   :  { %v419_v59 = vadd.f32 %v418_v36, %v417_v15  ;;  %v667_v40 = vsel %vm666_vm14, %v2052_v53, %v665_v63  ;;  %v412_v61 = vrot.slane %v411_v32, 1  ;;  %v436_v8 = vrot.slane %v435_v19, 1 }
  0xeb   :  { %v681_v20 = vsel %vm672_vm1, %v401_v43, %v680_v38  ;;  %v669_v30 = vsel %vm668_vm15, %v347_v55, %v667_v40  ;;  %v690_v0 = vsel %vm662_vm9, %v2034_v41, %v2005_v50  ;;  %vm983_vm4 = vcmask 64512   ;;  %v2246_v38 = vld [vmem:[#allocation21_spill] sm:$0xff]  ;;  %v2248_v40 = vld [vmem:[#allocation18_spill] sm:$0xff]  ;;  %p1719_p13 = por %p1718_p12, %p1717_p11 }
  0xec   :  { %v682_v52 = vsel %vm674_vm2, %v425_v21, %v681_v20  ;;  %v671_v23 = vsel %vm670_vm0, %v371_v22, %v669_v30  ;;  %v413_v62 = vadd.f32 %v412_v61, %v411_v32  ;;  %v691_v15 = vsel %vm664_vm13, %v2046_v44, %v690_v0  ;;  %v2242_v32 = vld [vmem:[#allocation22_spill] sm:$0xff]  ;;  %v2245_v22 = vld [vmem:[#allocation24_spill] sm:$0xff]  ;;  %v2252_v20 = vld [vmem:[#allocation19_spill] sm:$0xff] }
  0xed   :  { %765 = vmatprep.mubr.f32.mxu0 %v682_v52  ;;  %907 = vmatprep.mubr.f32.mxu1 %v682_v52  ;;  %v673_v53 = vsel %vm672_vm1, %v395_v49, %v671_v23  ;;  %v437_v54 = vadd.f32 %v436_v8, %v435_v19  ;;  %v692_v55 = vsel %vm666_vm14, %v2060_v26, %v691_v15  ;;  %v232_v50 = vsel %vm144_vm3, %v1992_v34, 0.0  ;;  %v553_v19 = vld [vmem:[#allocation5 + $0x398] sm:$0xff]  ;;  %v2251_v61 = vld [vmem:[#allocation20_spill] sm:$0xff]  ;;  %v552_v8 = vld [vmem:[#allocation5 + $0x390] sm:$0xff]  ;;  %p1720_p0 = pnand %p1719_p13, %p1713_p10 }
  0xee   :  { %vm148_vm5 = vcmp.eq.s32.totalorder %v1921_v1, %v1987_v24  ;;  %v675_v41 = vsel %vm674_vm2, %v419_v59, %v673_v53  ;;  %v693_v44 = vsel %vm668_vm15, %v365_v56, %v692_v55  ;;  %v306_v58 = vrot.slane %v2011_v45, 4  ;;  %v555_v0 = vld [vmem:[#allocation5 + $0x3a8] sm:$0xff]  ;;  %v554_v15 = vld [vmem:[#allocation5 + $0x3a0] sm:$0xff]  ;;  %v557_v53 = vld [vmem:[#allocation5 + $0x3b8] sm:$0xff] }
  0xef   :  { %vm152_vm6 = vcmp.eq.s32.totalorder %v1921_v1, %v2013_v46  ;;  %v236_v26 = vsel %vm148_vm5, %v2017_v9, 0.0  ;;  %766 = vmatmul.mubr.f32.vlgmr.msra.gmra.mrb[0].mxu0 %v675_v41  ;;  %908 = vmatmul.mubr.f32.vlgmr.msra.gmra.mrb[0].mxu1 %v675_v41  ;;  %v694_v24 = vsel %vm670_vm0, %v389_v60, %v693_v44  ;;  %v330_v42 = vrot.slane %v2044_v6, 4  ;;  %v549_v9 = vld [vmem:[#allocation5 + $0x378] sm:$0xff]  ;;  %v562_v41 = vld [vmem:[#allocation5 + $0x3e0] sm:$0xff]  ;;  %v608_v44 = vld [vmem:[#allocation5 + $0x550] sm:$0xff] }
  0xf0   :  { %v240_v34 = vsel %vm152_vm6, %v2068_v31, 0.0  ;;  %v2236_v56 = vpack.c.bf16 %v1904_v4, %v1902_v3  ;;  %v2237_v25 = vpack.c.bf16 %v1908_v10, %v1906_v7  ;;  %v695_v46 = vsel %vm672_vm1, %v413_v62, %v694_v24  ;;  %v2239_v4 = vld [vmem:[#allocation16_spill] sm:$0xff]  ;;  %v2240_v7 = vld [vmem:[#allocation15_spill] sm:$0xff] }
  0xf1   :  { %v984_v17 = vsel %vm983_vm4, %v1645_v57, 0.0  ;;  %v354_v29 = vrot.slane %v232_v50, 4  ;;  %v696_v31 = vsel %vm674_vm2, %v437_v54, %v695_v46  ;;  %v2238_v3 = vpack.c.bf16 %v1912_v12, %v1910_v11  ;;  %v556_v11 = vld [vmem:[#allocation5 + $0x3b0] sm:$0xff]  ;;  %v602_v12 = vld [vmem:[#allocation5 + $0x520] sm:$0xff]  ;;  %v559_v54 = vld [vmem:[#allocation5 + $0x3c8] sm:$0xff] }
  0xf2   :  { %1448 = vmatpush1.bf16.msra.mxu0 %v2236_v56  ;;  %1544 = vmatpush3.bf16.msra.mxu1 %v2237_v25  ;;  %v2241_v10 = vpack.c.bf16 %v2239_v4, %v2240_v7  ;;  %v1453_v2 = vpack.c.bf16 %v550_v5, %v547_v28  ;;  %v1549_v33 = vpack.c.bf16 %v599_v47, %v596_v39  ;;  %v2243_v18 = vrot.slane %v2242_v32, 4  ;;  %v611_v5 = vld [vmem:[#allocation5 + $0x568] sm:$0xff]  ;;  %v558_v56 = vld [vmem:[#allocation5 + $0x3c0] sm:$0xff]  ;;  %v561_v25 = vld [vmem:[#allocation5 + $0x3d8] sm:$0xff] }
  0xf3   :  { %1450 = vmatprep.subr.bf16.mxu0 %v2238_v3  ;;  %v378_v21 = vrot.slane %v236_v26, 4  ;;  %vm156_vm7 = vcmp.eq.s32.totalorder %v1921_v1, %v2244_v37  ;;  %836 = vmatprep.mubr.f32.mxu0 %v696_v31  ;;  %v307_v14 = vadd.f32 %v306_v58, %v2011_v45  ;;  %v402_v35 = vrot.slane %v240_v34, 4  ;;  %v2249_v1 = vld [vmem:[#allocation17_spill] sm:$0xff]  ;;  %v563_v57 = vld [vmem:[#allocation5 + $0x3e8] sm:$0xff]  ;;  %v614_v4 = vld [vmem:[#allocation5 + $0x580] sm:$0xff] }
  0xf4   :  { %1546 = vmatprep.subr.bf16.mxu1 %v2241_v10  ;;  %v283_v27 = vadd.f32 %v2243_v18, %v2242_v32  ;;  %977 = vmatprep.mubr.f32.mxu1 %v696_v31  ;;  %v244_v36 = vsel %vm156_vm7, %v2245_v22, 0.0  ;;  %v1455_v43 = vpack.c.bf16 %v549_v9, %v546_v48  ;;  %v2247_v49 = vrot.slane %v2246_v38, 4  ;;  %v617_v7 = vld [vmem:[#allocation5 + $0x598] sm:$0xff]  ;;  %v564_v32 = vld [vmem:[#allocation5 + $0x3f0] sm:$0xff]  ;;  %v567_v18 = vld [vmem:[#allocation5 + $0x408] sm:$0xff] }
  0xf5   :  { %985 = vadd.xlane.f32.xlu0 %v984_v17  ;;  %v331_v59 = vadd.f32 %v330_v42, %v2044_v6  ;;  %v2250_v60 = vpack.c.bf16 %v2248_v40, %v2249_v1  ;;  %v2253_v30 = vpack.c.bf16 %v2251_v61, %v2252_v20  ;;  %v1551_v45 = vpack.c.bf16 %v551_v13, %v548_v16  ;;  %v565_v17 = vld [vmem:[#allocation5 + $0x3f8] sm:$0xff]  ;;  %v570_v61 = vld [vmem:[#allocation5 + $0x420] sm:$0xff] }
  0xf6   :  { %v259_v63 = vadd.f32 %v2247_v49, %v2246_v38  ;;  %v355_v52 = vadd.f32 %v354_v29, %v232_v50  ;;  %v1457_v23 = vpack.c.bf16 %v556_v11, %v553_v19  ;;  %v1553_v62 = vpack.c.bf16 %v605_v51, %v602_v12  ;;  %v566_v11 = vld [vmem:[#allocation5 + $0x400] sm:$0xff]  ;;  %v569_v12 = vld [vmem:[#allocation5 + $0x418] sm:$0xff]  ;;  %v571_v51 = vld [vmem:[#allocation5 + $0x428] sm:$0xff] }
  0xf7   :  { %1452 = vmatpush1.bf16.msra.mxu0 %v2250_v60  ;;  %1548 = vmatpush3.bf16.msra.mxu1 %v2253_v30  ;;  %v284_v6 = vrot.slane %v283_v27, 2  ;;  %v379_v55 = vadd.f32 %v378_v21, %v236_v26  ;;  %v426_v28 = vrot.slane %v244_v36, 4  ;;  %v308_v39 = vrot.slane %v307_v14, 2  ;;  %v560_v26 = vld [vmem:[#allocation5 + $0x3d0] sm:$0xff]  ;;  %v623_v38 = vld [vmem:[#allocation5 + $0x5c8] sm:$0xff]  ;;  %v573_v20 = vld [vmem:[#allocation5 + $0x438] sm:$0xff] }
  0xf8   :  { %1454 = vmatprep.subr.bf16.mxu0 %v1453_v2  ;;  %1550 = vmatprep.subr.bf16.mxu1 %v1549_v33  ;;  %v403_v47 = vadd.f32 %v402_v35, %v240_v34  ;;  %v260_v58 = vrot.slane %v259_v63, 2  ;;  %v332_v24 = vrot.slane %v331_v59, 2  ;;  %v1459_v50 = vpack.c.bf16 %v555_v0, %v552_v8  ;;  %v568_v34 = vld [vmem:[#allocation5 + $0x410] sm:$0xff]  ;;  %v574_v35 = vld [vmem:[#allocation5 + $0x440] sm:$0xff] }
  0xf9   :  { %v1555_v42 = vpack.c.bf16 %v557_v53, %v554_v15  ;;  %v356_v46 = vrot.slane %v355_v52, 2  ;;  %v1461_v48 = vpack.c.bf16 %v562_v41, %v559_v54  ;;  %v1557_v9 = vpack.c.bf16 %v611_v5, %v608_v44  ;;  %v572_v0 = vld [vmem:[#allocation5 + $0x430] sm:$0xff] }
  0xfa   :  { %v285_v29 = vadd.f32 %v284_v6, %v283_v27  ;;  %v380_v31 = vrot.slane %v379_v55, 2  ;;  %v427_v3 = vadd.f32 %v426_v28, %v244_v36  ;;  %v309_v10 = vadd.f32 %v308_v39, %v307_v14  ;;  %v580_v54 = vld [vmem:[#allocation5 + $0x470] sm:$0xff]  ;;  %v626_v6 = vld [vmem:[#allocation5 + $0x5e0] sm:$0xff] }
  0xfb   :  { %1456 = vmatpush1.bf16.msra.mxu0 %v1455_v43  ;;  %1552 = vmatpush3.bf16.msra.mxu1 %v1551_v45  ;;  %v404_v2 = vrot.slane %v403_v47, 2  ;;  %v1463_v33 = vpack.c.bf16 %v561_v25, %v558_v56  ;;  %v261_v16 = vadd.f32 %v260_v58, %v259_v63  ;;  %v333_v13 = vadd.f32 %v332_v24, %v331_v59  ;;  %v620_v43 = vld [vmem:[#allocation5 + $0x5b0] sm:$0xff]  ;;  %v579_v56 = vld [vmem:[#allocation5 + $0x468] sm:$0xff]  ;;  %v578_v25 = vld [vmem:[#allocation5 + $0x460] sm:$0xff] }
  0xfc   :  { %1458 = vmatprep.subr.bf16.mxu0 %v1457_v23  ;;  %1554 = vmatprep.subr.bf16.mxu1 %v1553_v62  ;;  %v1559_v19 = vpack.c.bf16 %v563_v57, %v560_v26  ;;  %v357_v21 = vadd.f32 %v356_v46, %v355_v52  ;;  %v1465_v37 = vpack.c.bf16 %v568_v34, %v565_v17  ;;  %v286_v22 = vrot.slane %v285_v29, 1  ;;  %v575_v52 = vld [vmem:[#allocation5 + $0x448] sm:$0xff]  ;;  %v577_v23 = vld [vmem:[#allocation5 + $0x458] sm:$0xff]  ;;  %v576_v58 = vld [vmem:[#allocation5 + $0x450] sm:$0xff] }
  0xfd   :  { %v1561_v27 = vpack.c.bf16 %v617_v7, %v614_v4  ;;  %v381_v36 = vadd.f32 %v380_v31, %v379_v55  ;;  %v428_v14 = vrot.slane %v427_v3, 2  ;;  %v310_v49 = vrot.slane %v309_v10, 1  ;;  %v629_v55 = vld [vmem:[#allocation5 + $0x5f8] sm:$0xff]  ;;  %v583_v57 = vld [vmem:[#allocation5 + $0x488] sm:$0xff]  ;;  %v586_v17 = vld [vmem:[#allocation5 + $0x4a0] sm:$0xff] }
  0xfe   :  { %v405_v63 = vadd.f32 %v404_v2, %v403_v47  ;;  %v262_v59 = vrot.slane %v261_v16, 1  ;;  %v334_v40 = vrot.slane %v333_v13, 1  ;;  %v1467_v1 = vpack.c.bf16 %v567_v18, %v564_v32  ;;  %v581_v46 = vld [vmem:[#allocation5 + $0x478] sm:$0xff]  ;;  %v582_v2 = vld [vmem:[#allocation5 + $0x480] sm:$0xff]  ;;  %v592_v32 = vld [vmem:[#allocation5 + $0x4d0] sm:$0xff] }
  0xff   :  { %1460 = vmatpush1.bf16.msra.mxu0 %v1459_v50  ;;  %1556 = vmatpush3.bf16.msra.mxu1 %v1555_v42  ;;  %v1563_v60 = vpack.c.bf16 %v569_v12, %v566_v11  ;;  %v358_v30 = vrot.slane %v357_v21, 1  ;;  %v1469_v45 = vpack.c.bf16 %v574_v35, %v571_v51  ;;  %v1565_v8 = vpack.c.bf16 %v623_v38, %v620_v43  ;;  %v591_v11 = vld [vmem:[#allocation5 + $0x4c8] sm:$0xff]  ;;  %v594_v35 = vld [vmem:[#allocation5 + $0x4e0] sm:$0xff]  ;;  %v597_v43 = vld [vmem:[#allocation5 + $0x4f8] sm:$0xff] }
 0x100   :  { %1462 = vmatprep.subr.bf16.mxu0 %v1461_v48  ;;  %1558 = vmatprep.subr.bf16.mxu1 %v1557_v9  ;;  %v287_v62 = vadd.f32 %v286_v22, %v285_v29  ;;  %v382_v15 = vrot.slane %v381_v36, 1  ;;  %v429_v53 = vadd.f32 %v428_v14, %v427_v3  ;;  %v311_v28 = vadd.f32 %v310_v49, %v309_v10  ;;  %v595_v51 = vld [vmem:[#allocation5 + $0x4e8] sm:$0xff]  ;;  %v598_v22 = vld [vmem:[#allocation5 + $0x500] sm:$0xff]  ;;  %v601_v38 = vld [vmem:[#allocation5 + $0x518] sm:$0xff] }
 0x101   :  { %v406_v41 = vrot.slane %v405_v63, 1  ;;  %v1471_v44 = vpack.c.bf16 %v573_v20, %v570_v61  ;;  %v263_v5 = vadd.f32 %v262_v59, %v261_v16  ;;  %v335_v39 = vadd.f32 %v334_v40, %v333_v13  ;;  %v604_v49 = vld [vmem:[#allocation5 + $0x530] sm:$0xff]  ;;  %v610_v61 = vld [vmem:[#allocation5 + $0x560] sm:$0xff] }
 0x102   :  { %v1567_v47 = vpack.c.bf16 %v575_v52, %v572_v0  ;;  %v359_v24 = vadd.f32 %v358_v30, %v357_v21  ;;  %v1473_v50 = vpack.c.bf16 %v580_v54, %v577_v23  ;;  %v1569_v42 = vpack.c.bf16 %v629_v55, %v626_v6  ;;  %v600_v40 = vld [vmem:[#allocation5 + $0x510] sm:$0xff]  ;;  %v613_v0 = vld [vmem:[#allocation5 + $0x578] sm:$0xff]  ;;  %v619_v54 = vld [vmem:[#allocation5 + $0x5a8] sm:$0xff] }
 0x103   :  { %1464 = vmatpush1.bf16.msra.mxu0 %v1463_v33  ;;  %1560 = vmatpush3.bf16.msra.mxu1 %v1559_v19  ;;  %v683_v48 = vsel %vm662_vm9, %v287_v62, %v263_v5  ;;  %v383_v9 = vadd.f32 %v382_v15, %v381_v36  ;;  %v430_v26 = vrot.slane %v429_v53, 1  ;;  %v407_v29 = vadd.f32 %v406_v41, %v405_v63  ;;  %v585_v33 = vld [vmem:[#allocation5 + $0x498] sm:$0xff]  ;;  %v616_v52 = vld [vmem:[#allocation5 + $0x590] sm:$0xff]  ;;  %v622_v6 = vld [vmem:[#allocation5 + $0x5c0] sm:$0xff] }
 0x104   :  { %1466 = vmatprep.subr.bf16.mxu0 %v1465_v37  ;;  %1562 = vmatprep.subr.bf16.mxu1 %v1561_v27  ;;  %v684_v31 = vsel %vm664_vm13, %v311_v28, %v683_v48  ;;  %v1475_v3 = vpack.c.bf16 %v579_v56, %v576_v58  ;;  %v1571_v34 = vpack.c.bf16 %v581_v46, %v578_v25  ;;  %v589_v19 = vld [vmem:[#allocation5 + $0x4b8] sm:$0xff]  ;;  %v588_v27 = vld [vmem:[#allocation5 + $0x4b0] sm:$0xff]  ;;  %v618_v41 = vld [vmem:[#allocation5 + $0x5a0] sm:$0xff]  ;;  %vm1772_vm8 = vmmov 0  }
 0x105   :  { %v685_v4 = vsel %vm666_vm14, %v335_v39, %v684_v31  ;;  %v1477_v7 = vpack.c.bf16 %v586_v17, %v583_v57  ;;  %v431_v16 = vadd.f32 %v430_v26, %v429_v53  ;;  %v1479_v21 = vpack.c.bf16 %v585_v33, %v582_v2  ;;  %v612_v15 = vld [vmem:[#allocation5 + $0x570] sm:$0xff]  ;;  %v615_v53 = vld [vmem:[#allocation5 + $0x588] sm:$0xff]  ;;  %v625_v5 = vld [vmem:[#allocation5 + $0x5d8] sm:$0xff] }
 0x106   :  { %v686_v10 = vsel %vm668_vm15, %v359_v24, %v685_v4  ;;  %v1481_v37 = vpack.c.bf16 %v592_v32, %v589_v19  ;;  %v1483_v36 = vpack.c.bf16 %v591_v11, %v588_v27  ;;  %v1485_v14 = vpack.c.bf16 %v598_v22, %v595_v51  ;;  %v628_v39 = vld [vmem:[#allocation5 + $0x5f0] sm:$0xff]  ;;  %v1013_v56 = vld [vmem:[#allocation7 + $0x80] sm:$0xff]  ;;  %v1014_v25 = vld [vmem:[#allocation7 + $0x88] sm:$0xff] }
 0x107   :  { %1468 = vmatpush1.bf16.msra.mxu0 %v1467_v1  ;;  %1564 = vmatpush3.bf16.msra.mxu1 %v1563_v60  ;;  %v687_v13 = vsel %vm670_vm0, %v383_v9, %v686_v10  ;;  %v1487_v63 = vpack.c.bf16 %v597_v43, %v594_v35  ;;  %v1489_v59 = vpack.c.bf16 %v604_v49, %v601_v38  ;;  %v603_v1 = vld [vmem:[#allocation5 + $0x528] sm:$0xff]  ;;  %v624_v24 = vld [vmem:[#allocation5 + $0x5d0] sm:$0xff]  ;;  %v997_v46 = vld [vmem:[#allocation7] sm:$0xff] }
 0x108   :  { %1470 = vmatprep.subr.bf16.mxu0 %v1469_v45  ;;  %1566 = vmatprep.subr.bf16.mxu1 %v1565_v8  ;;  %v688_v18 = vsel %vm672_vm1, %v407_v29, %v687_v13  ;;  %v607_v60 = vld [vmem:[#allocation5 + $0x548] sm:$0xff]  ;;  %v1491_v20 = vpack.c.bf16 %v603_v1, %v600_v40  ;;  %v606_v45 = vld [vmem:[#allocation5 + $0x540] sm:$0xff]  ;;  %v609_v8 = vld [vmem:[#allocation5 + $0x558] sm:$0xff]  ;;  %v1497_v62 = vpack.c.bf16 %v616_v52, %v613_v0 }
 0x109   :  { %v689_v12 = vsel %vm674_vm2, %v431_v16, %v688_v18  ;;  %v1493_v30 = vpack.c.bf16 %v610_v61, %v607_v60  ;;  %v1495_v23 = vpack.c.bf16 %v609_v8, %v606_v45  ;;  %v1499_v55 = vpack.c.bf16 %v615_v53, %v612_v15  ;;  %v998_v9 = vld [vmem:[#allocation7 + $0x8] sm:$0xff]  ;;  %v1015_v26 = vld [vmem:[#allocation7 + $0x90] sm:$0xff]  ;;  %v1016_v57 = vld [vmem:[#allocation7 + $0x98] sm:$0xff] }
 0x10a   :  { %v1501_v28 = vpack.c.bf16 %v622_v6, %v619_v54  ;;  %v1505_v58 = vpack.c.bf16 %v628_v39, %v625_v5  ;;  %v1573_v48 = vpack.c.bf16 %v1014_v25, %v1013_v56  ;;  %v1575_v17 = vpack.c.bf16 %v998_v9, %v997_v46  ;;  %v999_v31 = vld [vmem:[#allocation7 + $0x10] sm:$0xff]  ;;  %v1018_v4 = vld [vmem:[#allocation7 + $0xa8] sm:$0xff]  ;;  %v1001_v2 = vld [vmem:[#allocation7 + $0x20] sm:$0xff] }
 0x10b   :  { %1472 = vmatpush1.bf16.msra.mxu0 %v1471_v44  ;;  %1568 = vmatpush3.bf16.msra.mxu1 %v1567_v47  ;;  %v621_v44 = vld [vmem:[#allocation5 + $0x5b8] sm:$0xff]  ;;  %v1577_v29 = vpack.c.bf16 %v1016_v57, %v1015_v26  ;;  %v1002_v33 = vld [vmem:[#allocation7 + $0x28] sm:$0xff]  ;;  %v1019_v16 = vld [vmem:[#allocation7 + $0xb0] sm:$0xff] }
 0x10c   :  { %1474 = vmatprep.subr.bf16.mxu0 %v1473_v50  ;;  %1570 = vmatprep.subr.bf16.mxu1 %v1569_v42  ;;  %v1503_v47 = vpack.c.bf16 %v621_v44, %v618_v41  ;;  %v627_v50 = vld [vmem:[#allocation5 + $0x5e8] sm:$0xff]  ;;  %v1020_v13 = vld [vmem:[#allocation7 + $0xb8] sm:$0xff]  ;;  %v1583_v19 = vpack.c.bf16 %v1002_v33, %v1001_v2  ;;  %v1003_v18 = vld [vmem:[#allocation7 + $0x30] sm:$0xff] }
 0x10d   :  { %v1507_v42 = vpack.c.bf16 %v627_v50, %v624_v24  ;;  %v1585_v32 = vpack.c.bf16 %v1020_v13, %v1019_v16  ;;  %v1022_v27 = vld [vmem:[#allocation7 + $0xc8] sm:$0xff]  ;;  %v1005_v51 = vld [vmem:[#allocation7 + $0x40] sm:$0xff]  ;;  %v1007_v38 = vld [vmem:[#allocation7 + $0x50] sm:$0xff] }
 0x10e   :  { %v1006_v22 = vld [vmem:[#allocation7 + $0x48] sm:$0xff]  ;;  %v1008_v49 = vld [vmem:[#allocation7 + $0x58] sm:$0xff]  ;;  %v1009_v60 = vld [vmem:[#allocation7 + $0x60] sm:$0xff] }
 0x10f   :  { %1476 = vmatpush1.bf16.msra.mxu0 %v1475_v3  ;;  %1572 = vmatpush3.bf16.msra.mxu1 %v1571_v34  ;;  %v1000_v3 = vld [vmem:[#allocation7 + $0x18] sm:$0xff]  ;;  %v1017_v34 = vld [vmem:[#allocation7 + $0xa0] sm:$0xff]  ;;  %v1591_v35 = vpack.c.bf16 %v1006_v22, %v1005_v51  ;;  %v1595_v40 = vpack.c.bf16 %v1008_v49, %v1007_v38  ;;  %v1010_v61 = vld [vmem:[#allocation7 + $0x68] sm:$0xff] }
 0x110   :  { %1478 = vmatprep.subr.bf16.mxu0 %v1477_v7  ;;  %1574 = vmatprep.subr.bf16.mxu1 %v1573_v48  ;;  %v1579_v7 = vpack.c.bf16 %v1000_v3, %v999_v31  ;;  %v1581_v10 = vpack.c.bf16 %v1018_v4, %v1017_v34  ;;  %v1028_v45 = vld [vmem:[#allocation7 + $0xf8] sm:$0xff]  ;;  %v1011_v0 = vld [vmem:[#allocation7 + $0x70] sm:$0xff]  ;;  %v1029_v50 = vld [vmem:[#allocation7 + $0x100] sm:$0xff] }
 0x111   :  { %v1012_v52 = vld [vmem:[#allocation7 + $0x78] sm:$0xff]  ;;  %v1031_v26 = vld [vmem:[#allocation7 + $0x110] sm:$0xff]  ;;  %v1033_v31 = vld [vmem:[#allocation7 + $0x120] sm:$0xff] }
 0x112   :  { %978 = vmatmul.mubr.f32.vlgmr.msra.gmra.mrb[2].mxu1 %v689_v12  ;;  %v1032_v57 = vld [vmem:[#allocation7 + $0x118] sm:$0xff]  ;;  %v1034_v3 = vld [vmem:[#allocation7 + $0x128] sm:$0xff]  ;;  %v1035_v4 = vld [vmem:[#allocation7 + $0x130] sm:$0xff] }
 0x113   :  { %1480 = vmatpush1.bf16.msra.mxu0 %v1479_v21  ;;  %1576 = vmatpush3.bf16.msra.mxu1 %v1575_v17  ;;  %v1004_v21 = vld [vmem:[#allocation7 + $0x38] sm:$0xff]  ;;  %v1609_v17 = vpack.c.bf16 %v1032_v57, %v1031_v26  ;;  %v1612_v34 = vpack.c.bf16 %v1034_v3, %v1033_v31  ;;  %v1037_v2 = vld [vmem:[#allocation7 + $0x140] sm:$0xff]  ;;  %v1038_v33 = vld [vmem:[#allocation7 + $0x148] sm:$0xff] }
 0x114   :  { %1482 = vmatprep.subr.bf16.mxu0 %v1481_v37  ;;  %1578 = vmatprep.subr.bf16.mxu1 %v1577_v29  ;;  %v1021_v37 = vld [vmem:[#allocation7 + $0xc0] sm:$0xff]  ;;  %v1587_v11 = vpack.c.bf16 %v1004_v21, %v1003_v18  ;;  %v1773_v29 = vmov 0.0   ;;  %v1618_v16 = vpack.c.bf16 %v1038_v33, %v1037_v2  ;;  %v1039_v13 = vld [vmem:[#allocation7 + $0x150] sm:$0xff]  ;;  %v1042_v21 = vld [vmem:[#allocation7 + $0x168] sm:$0xff] }
 0x115   :  { %v1041_v18 = vld [vmem:[#allocation7 + $0x160] sm:$0xff] }
 0x117   :  { %1484 = vmatpush1.bf16.msra.mxu0 %v1483_v36  ;;  %1580 = vmatpush3.bf16.msra.mxu1 %v1579_v7  ;;  %v1023_v36 = vld [vmem:[#allocation7 + $0xd0] sm:$0xff]  ;;  %v1036_v7 = vld [vmem:[#allocation7 + $0x138] sm:$0xff] }
 0x118   :  { %1486 = vmatprep.subr.bf16.mxu0 %v1485_v14  ;;  %1582 = vmatprep.subr.bf16.mxu1 %v1581_v10  ;;  %v1024_v14 = vld [vmem:[#allocation7 + $0xd8] sm:$0xff]  ;;  %v1615_v10 = vpack.c.bf16 %v1036_v7, %v1035_v4 }
 0x119   :  { %v1593_v43 = vpack.c.bf16 %v1024_v14, %v1023_v36 }
 0x11b   :  { %1488 = vmatpush1.bf16.msra.mxu0 %v1487_v63  ;;  %1584 = vmatpush3.bf16.msra.mxu1 %v1583_v19  ;;  %v1025_v63 = vld [vmem:[#allocation7 + $0xe0] sm:$0xff]  ;;  %v1040_v19 = vld [vmem:[#allocation7 + $0x158] sm:$0xff] }
 0x11c   :  { %1490 = vmatprep.subr.bf16.mxu0 %v1489_v59  ;;  %1586 = vmatprep.subr.bf16.mxu1 %v1585_v32  ;;  %v1026_v59 = vld [vmem:[#allocation7 + $0xe8] sm:$0xff]  ;;  %v1621_v32 = vpack.c.bf16 %v1040_v19, %v1039_v13 }
 0x11d   :  { %v1597_v1 = vpack.c.bf16 %v1026_v59, %v1025_v63 }
 0x11f   :  { %1492 = vmatpush1.bf16.msra.mxu0 %v1491_v20  ;;  %1588 = vmatpush3.bf16.msra.mxu1 %v1587_v11  ;;  %v1599_v20 = vpack.c.bf16 %v1010_v61, %v1009_v60  ;;  %v1044_v11 = vld [vmem:[#allocation7 + $0x178] sm:$0xff] }
 0x120   :  { %1494 = vmatprep.subr.bf16.mxu0 %v1493_v30  ;;  %v1027_v30 = vld [vmem:[#allocation7 + $0xf0] sm:$0xff] }
 0x121   :  { %v1601_v8 = vpack.c.bf16 %v1028_v45, %v1027_v30 }
 0x123   :  { %1496 = vmatpush1.bf16.msra.mxu0 %v1495_v23  ;;  %v1603_v23 = vpack.c.bf16 %v1012_v52, %v1011_v0 }
 0x124   :  { %1498 = vmatprep.subr.bf16.mxu0 %v1497_v62  ;;  %v1771_v62 = vmov 0.0|0.0  }
 0x127   :  { %1500 = vmatpush1.bf16.msra.mxu0 %v1499_v55 }
 0x128   :  { %1502 = vmatprep.subr.bf16.mxu0 %v1501_v28 }
 0x12b   :  { %1504 = vmatpush1.bf16.msra.mxu0 %v1503_v47 }
 0x12c   :  { %1506 = vmatprep.subr.bf16.mxu0 %v1505_v58 }
 0x12f   :  { %1508 = vmatpush1.bf16.msra.mxu0 %v1507_v42  ;;  %v1030_v42 = vld [vmem:[#allocation7 + $0x108] sm:$0xff] }
 0x130   :  { %v1606_v9 = vpack.c.bf16 %v1030_v42, %v1029_v50 }
 0x132   :  { %837 = vmatmul.mubr.f32.vlgmr.msra.gmra.mrb[0].mxu0 %v689_v12  ;;  %v1589_v12 = vpack.c.bf16 %v1022_v27, %v1021_v37  ;;  %v1624_v37 = vpack.c.bf16 %v1042_v21, %v1041_v18  ;;  %v1043_v27 = vld [vmem:[#allocation7 + $0x170] sm:$0xff] }
 0x134   :  { %1590 = vmatprep.subr.bf16.mxu1 %v1589_v12  ;;  %v1627_v12 = vpack.c.bf16 %v1044_v11, %v1043_v27 }
 0x135   :  { %1592 = vmatpush3.bf16.msra.mxu1 %v1591_v35 }
 0x136   :  { %1594 = vmatprep.subr.bf16.mxu1 %v1593_v43 }
 0x139   :  { %1596 = vmatpush3.bf16.msra.mxu1 %v1595_v40 }
 0x13a   :  { %1598 = vmatprep.subr.bf16.mxu1 %v1597_v1 }
 0x13d   :  { %1600 = vmatpush3.bf16.msra.mxu1 %v1599_v20 }
 0x13e   :  { %1602 = vmatprep.subr.bf16.mxu1 %v1601_v8 }
 0x141   :  { %1604 = vmatpush3.bf16.msra.mxu1 %v1603_v23 }
 0x142   :  { %1605 = vmatprep.subr.bf16.mxu1 %v1771_v62 }
 0x182   :  { %v986_v6 = vpop.xlane.xlu0 %985 }
 0x183   :  { %1643 = vrcp.f32 %v986_v6 }
 0x18d   :  { %v1644_v55 = vpop.eup %1643 }
 0x18e   :  { %v988_v28 = vmul.f32 %v1644_v55, %v986_v6 }
 0x190   :  { %v989_v41 = vsub.f32 2.0, %v988_v28 }
 0x192   :  { %v990_v39 = vmul.f32 %v1644_v55, %v989_v41 }
 0x1c2   :  { %v1256_v15 = vpop.f32.mrb[0].mxu1 }
 0x1c3   :  { %v1257_v53 = vpop.f32.mrb[1].mxu1 }
 0x1c4   :  { %v1258_v54 = vadd.f32 %v1257_v53, %v1256_v15 }
 0x1e5   :  { %v1291_v44 = vpop.f32.mrb[2].mxu1 }
 0x1e6   :  { %v1292_v5 = vpop.f32.mrb[3].mxu1 }
 0x1e7   :  { %v1293_v47 = vadd.f32 %v1292_v5, %v1291_v44 }
 0x1e9   :  { %v980_v58 = vadd.f32 %v1293_v47, %v1258_v54 }
 0x1eb   :  { %v993_v24 = vmul.f32 %v990_v39, %v980_v58 }
 0x1ed   :  { %996 = vst [vmem:[#allocation8 + $0x10] sm:$0xff] %v993_v24 }
 0x205   :  { %v838_v56 = vpop.f32.mrb[0].mxu0 }
 0x206   :  { %v991_v25 = vmul.f32 %v990_v39, %v838_v56  ;;  %v840_v46 = vpop.f32.mrb[1].mxu0 }
 0x207   :  { %v992_v48 = vmul.f32 %v990_v39, %v840_v46 }
 0x208   :  { %994 = vst [vmem:[#allocation8] sm:$0xff] %v991_v25 }
 0x209   :  { %995 = vst [vmem:[#allocation8 + $0x8] sm:$0xff] %v992_v48  ;;  %1116 = vmatprep.mubr.f32.mxu1 %v992_v48 }
 0x20a   :  { %1117 = vmatmul.mubr.f32.vlgmr.msra.gmra.mrb[4].mxu1 %v991_v25 }
 0x20b   :  { %1607 = vmatpush3.bf16.msra.mxu1 %v1606_v9  ;;  %1378 = vmatprep.mubr.msk.f32.mxu1 %vm1772_vm8, %v1773_v29 }
 0x20c   :  { %1608 = vmatprep.subr.bf16.mxu1 %v1771_v62 }
 0x20f   :  { %1610 = vmatpush3.bf16.msra.mxu1 %v1609_v17 }
 0x210   :  { %1611 = vmatprep.subr.bf16.mxu1 %v1771_v62 }
 0x213   :  { %1613 = vmatpush3.bf16.msra.mxu1 %v1612_v34 }
 0x214   :  { %1614 = vmatprep.subr.bf16.mxu1 %v1771_v62 }
 0x217   :  { %1616 = vmatpush3.bf16.msra.mxu1 %v1615_v10 }
 0x218   :  { %1617 = vmatprep.subr.bf16.mxu1 %v1771_v62 }
 0x21b   :  { %1619 = vmatpush3.bf16.msra.mxu1 %v1618_v16 }
 0x21c   :  { %1620 = vmatprep.subr.bf16.mxu1 %v1771_v62 }
 0x21f   :  { %1622 = vmatpush3.bf16.msra.mxu1 %v1621_v32 }
 0x220   :  { %1623 = vmatprep.subr.bf16.mxu1 %v1771_v62 }
 0x223   :  { %1625 = vmatpush3.bf16.msra.mxu1 %v1624_v37 }
 0x224   :  { %1626 = vmatprep.subr.bf16.mxu1 %v1771_v62 }
 0x227   :  { %1628 = vmatpush3.bf16.msra.mxu1 %v1627_v12 }
 0x22a   :  { %1379 = vmatmul.mubr.f32.vlgmr.msra.gmra.mrb[6].mxu1 %v993_v24 }
 0x22b   :  { %1723 = shalt.err (!%p1720_p0)
}
 0x22c   :  { %s1724_s18 = scalar_lea.hbm %s2212_s5, 384 }
 0x22d   :  { %p1725_p1 = scmp.ne.s32.totalorder %s2212_s5, %s1724_s18  ;;  %p1728_p2 = scmp.lt.u32.totalorder %s1724_s18, %s2212_s5 }
 0x22f   :  { %p1730_p3 = pnand %p1728_p2, %p1725_p1 }
 0x231   :  { %1733 = shalt.err (!%p1730_p3)
}
 0x232   :  { %1202 = dma.vmem_to_hbm [thread:$0]  %s1200_s14, 384, %s2212_s5, [#allocation4]   ;;  %v1223_v14 = vld [vmem:[%s2210_s3] ss:$0 sm:$0xff] }
 0x233   :  { %s1775_s26 = smov [#allocation9]  }
 0x234   :  { %s1209_s27 = sshll.u32 %s1775_s26, 4  ;;  %s1210_s27 = int_to_ptr.vmem [resolvable:$true] %s1209_s27 }
 0x235   :  { %s1734_s28 = scalar_lea.vmem %s1210_s27, 128  ;;  %p1739_p5 = scmp.lt.s32.totalorder %s1210_s27, %s1210_s27 }
 0x236   :  { %p1735_p4 = scmp.ne.s32.totalorder %s1210_s27, %s1734_s28  ;;  %p1740_p6 = scmp.lt.s32.totalorder %s1734_s28, %s1734_s28 }
 0x238   :  { %p1741_p7 = por %p1740_p6, %p1739_p5 }
 0x23a   :  { %p1742_p8 = pnand %p1741_p7, %p1735_p4 }
 0x2dd   :  { %v1326_v51 = vpop.f32.mrb[4].mxu1 }
 0x2de   :  { %v1327_v22 = vpop.f32.mrb[5].mxu1 }
 0x2df   :  { %v1328_v36 = vadd.f32 %v1327_v22, %v1326_v51 }
 0x2e1   :  { %v1119_v35 = vadd.f32 %v1328_v36, %v1223_v14 }
 0x2fd   :  { %v1188_v43 = vpop.f32.mrb[6].mxu1 }
 0x2fe   :  { %v1189_v38 = vadd.f32 %v1188_v43, %v1119_v35  ;;  %v1380_v49 = vpop.f32.mrb[7].mxu1 }
 0x300   :  { %1192 = vst [vmem:[#allocation9] sm:$0xff] %v1189_v38 }
 0x301   :  { %1745 = shalt.err (!%p1742_p8)
}
 0x302   :  { %s1746_s30 = scalar_lea.hbm %s2213_s6, 128 }
 0x303   :  { %p1747_p9 = scmp.ne.s32.totalorder %s2213_s6, %s1746_s30  ;;  %p1750_p10 = scmp.lt.u32.totalorder %s1746_s30, %s2213_s6 }
 0x305   :  { %p1752_p11 = pnand %p1750_p10, %p1747_p9 }
 0x307   :  { %1755 = shalt.err (!%p1752_p11)
}
 0x308   :  { %1212 = dma.vmem_to_hbm [thread:$0]  %s1210_s27, 128, %s2213_s6, [#allocation10]  }
 0x309   :  { %1760 = dma.done.wait [#allocation4], 384  }
 0x30a   :  { %1761 = vsyncadd [#allocation4], 4294966912 }
 0x30b   :  { %1762 = dma.done.wait [#allocation10], 128  }
 0x30c   :  { %1763 = vsyncadd [#allocation10], 4294967168 }
 0x30d   :  { %1219 = vsyncpa [#allocation3], 1 }
 0x30e   :  { %1220 = vsyncpa [#allocation6], 1 }
 0x30f   :  { %1221 = vsyncpa [#allocation4], 1 }
 0x310   :  { %1222 = vsyncpa [#allocation10], 1 }

</bundles_post_ra>
